<compile_context>
chip_gen: v7x
topology: tpu7x:2x2x1
jax: 0.10.0
libtpu: 0.0.40
codegen_flags: <defaults>
</compile_context>

<pallas_src>
import functools
import math

import jax
import jax.numpy as jnp
from jax import lax
from jax.experimental import pallas as pl
from jax.experimental.pallas import tpu as pltpu


# ---------------------------------------------------------------------------
# Tiling helpers
# ---------------------------------------------------------------------------
def _tile(dim, preferred, quantum):
    """Largest multiple of `quantum` that divides `dim`, capped at `preferred`."""
    if dim <= preferred:
        return dim
    t = (min(preferred, dim) // quantum) * quantum
    while t >= quantum:
        if dim % t == 0:
            return t
        t -= quantum
    # No multiple of the quantum divides dim.  Only fall back to one full-dim block
    # when that is still a sane size; otherwise fail loudly instead of silently
    # creating a block that blows the scoped VMEM limit.
    if dim > 4 * preferred:
        raise ValueError(
            f"_tile: no legal tile for dim={dim} (quantum={quantum}); "
            f"pad the array to a multiple of {quantum}.")
    return dim


def _heads_per_group(num_heads, dk):
    """Heads per attention grid step so the per-group lane width (hg*dk) is a
    multiple of 128, or falls back to the full model dim (always legal)."""
    if dk % 128 == 0:
        return 1
    if 128 % dk == 0:
        hg = 128 // dk
        if hg <= num_heads and num_heads % hg == 0:
            return hg
    return num_heads


# ---------------------------------------------------------------------------
# Kernel 1: tiled matmul  o = act(x @ W + b), bf16 operands, f32 VMEM accumulator.
# Shared by the plain linear and the fused QKV projection.
# ---------------------------------------------------------------------------
def _matmul_kernel(x_ref, w_ref, b_ref, o_ref, acc_ref, *, activation):
    k = pl.program_id(2)

    @pl.when(k == 0)
    def _():
        acc_ref[...] = jnp.zeros_like(acc_ref)

    acc_ref[...] += jnp.dot(x_ref[...], w_ref[...],
                            preferred_element_type=jnp.float32)

    @pl.when(k == pl.num_programs(2) - 1)
    def _():
        y = acc_ref[...] + b_ref[...].astype(jnp.float32)
        if activation == "relu":
            y = jnp.maximum(y, 0.0)
        o_ref[...] = y.astype(o_ref.dtype)


def linear(x, w, b, activation=None, out_dtype=None, tm=512, tn=256, tk=512):
    # x: (M, K) bf16, w: (K, N) bf16, b: (1, N) f32
    M, K = x.shape
    N = w.shape[1]
    if out_dtype is None:
        out_dtype = x.dtype
    tm = _tile(M, tm, 8)
    tn = _tile(N, tn, 128)
    tk = _tile(K, tk, 128)
    grid = (M // tm, N // tn, K // tk)
    return pl.pallas_call(
        functools.partial(_matmul_kernel, activation=activation),
        out_shape=jax.ShapeDtypeStruct((M, N), out_dtype),
        grid=grid,
        in_specs=[
            pl.BlockSpec((tm, tk), lambda i, j, k: (i, k)),
            pl.BlockSpec((tk, tn), lambda i, j, k: (k, j)),
            pl.BlockSpec((1, tn), lambda i, j, k: (0, j)),
        ],
        out_specs=pl.BlockSpec((tm, tn), lambda i, j, k: (i, j)),
        scratch_shapes=[pltpu.VMEM((tm, tn), jnp.float32)],
        compiler_params=pltpu.CompilerParams(
            dimension_semantics=("parallel", "parallel", "arbitrary")),
    )(x, w, b)


def qkv_projection(x, wqkv, bqkv, tm=512, tk=512):
    # Fused Q/K/V projection: x (M, D) bf16, wqkv (3, D, D) bf16, bqkv (3, 1, D) f32
    # -> (3, M, D) bf16.  The x tile is re-fetched once per Q/K/V weight slab (j axis);
    # the dominant traffic (the 3*D*D weight stack) is streamed once per i-tile.
    M, K = x.shape
    D = wqkv.shape[-1]
    tm = _tile(M, tm, 8)
    tk = _tile(K, tk, 128)
    grid = (M // tm, 3, K // tk)
    return pl.pallas_call(
        functools.partial(_matmul_kernel, activation=None),
        out_shape=jax.ShapeDtypeStruct((3, M, D), x.dtype),
        grid=grid,
        in_specs=[
            pl.BlockSpec((tm, tk), lambda i, j, k: (i, k)),
            pl.BlockSpec((None, tk, D), lambda i, j, k: (j, k, 0)),
            pl.BlockSpec((None, 1, D), lambda i, j, k: (j, 0, 0)),
        ],
        out_specs=pl.BlockSpec((None, tm, D), lambda i, j, k: (j, i, 0)),
        scratch_shapes=[pltpu.VMEM((tm, D), jnp.float32)],
        compiler_params=pltpu.CompilerParams(
            dimension_semantics=("parallel", "parallel", "arbitrary")),
    )(x, wqkv, bqkv)


# ---------------------------------------------------------------------------
# Kernel 2: tiled matmul fused with residual add + LayerNorm epilogue:
#   o = LN(residual + x @ W + b) * gamma + beta       (N not tiled: full D)
# ---------------------------------------------------------------------------
def _matmul_add_norm_kernel(x_ref, w_ref, b_ref, res_ref, g_ref, bt_ref,
                            o_ref, acc_ref, *, eps):
    k = pl.program_id(1)

    @pl.when(k == 0)
    def _():
        acc_ref[...] = jnp.zeros_like(acc_ref)

    acc_ref[...] += jnp.dot(x_ref[...], w_ref[...],
                            preferred_element_type=jnp.float32)

    @pl.when(k == pl.num_programs(1) - 1)
    def _():
        z = (acc_ref[...] + b_ref[...].astype(jnp.float32)
             + res_ref[...].astype(jnp.float32))
        mu = jnp.mean(z, axis=-1, keepdims=True)
        var = jnp.mean((z - mu) ** 2, axis=-1, keepdims=True)
        zn = (z - mu) * lax.rsqrt(var + eps)
        o_ref[...] = (zn * g_ref[...] + bt_ref[...]).astype(o_ref.dtype)


def linear_add_norm(x, w, b, residual, gamma, beta, eps=1e-5,
                    out_dtype=jnp.float32, tm=512, tk=512):
    # x: (M, K) bf16, w: (K, D) bf16, b/gamma/beta: (1, D) f32, residual: (M, D) bf16
    M, K = x.shape
    D = w.shape[1]
    tm = _tile(M, tm, 8)
    tk = _tile(K, tk, 128)
    grid = (M // tm, K // tk)
    return pl.pallas_call(
        functools.partial(_matmul_add_norm_kernel, eps=eps),
        out_shape=jax.ShapeDtypeStruct((M, D), out_dtype),
        grid=grid,
        in_specs=[
            pl.BlockSpec((tm, tk), lambda i, k: (i, k)),
            pl.BlockSpec((tk, D), lambda i, k: (k, 0)),
            pl.BlockSpec((1, D), lambda i, k: (0, 0)),
            pl.BlockSpec((tm, D), lambda i, k: (i, 0)),
            pl.BlockSpec((1, D), lambda i, k: (0, 0)),
            pl.BlockSpec((1, D), lambda i, k: (0, 0)),
        ],
        out_specs=pl.BlockSpec((tm, D), lambda i, k: (i, 0)),
        scratch_shapes=[pltpu.VMEM((tm, D), jnp.float32)],
        compiler_params=pltpu.CompilerParams(
            dimension_semantics=("parallel", "arbitrary")),
    )(x, w, b, residual, gamma, beta)


# ---------------------------------------------------------------------------
# Kernel 3: multi-head attention.  Grid = (batch, head group, query tile);
# each step sees only its group's (S, hg*dk) K/V lane slab and (tq, hg*dk) Q slab.
# 1/sqrt(dk) is already folded into the Q projection weights.  Mask is an
# additive (0 / -1e9) f32 bias.  Each head's context is stored directly into
# its lane range of the (tq, hg*dk) output block; probs are written in bf16.
# ---------------------------------------------------------------------------
def _mha_kernel(q_ref, k_ref, v_ref, bias_ref, ctx_ref, probs_ref, *,
                heads_per_group, dk, exp_dtype):
    tq = q_ref.shape[0]
    S = k_ref.shape[0]
    q = q_ref[...]                                   # (tq, gw) bf16, scale folded in
    k = k_ref[...]                                   # (S,  gw) bf16
    v = v_ref[...]                                   # (S,  gw) bf16
    # Hoist the (1, S) -> (tq, S) bias broadcast out of the head loop
    # (JAX does not CSE broadcast_in_dim).
    bias = jnp.broadcast_to(bias_ref[...].astype(jnp.float32), (tq, S))

    for h in range(heads_per_group):                 # small static loop
        lo = h * dk
        qh = q[:, lo:lo + dk]                        # (tq, dk)
        kh = k[:, lo:lo + dk]                        # (S,  dk)
        vh = v[:, lo:lo + dk]                        # (S,  dk)
        # contract on dk without materializing k.T; bf16 operands, f32 result
        s = lax.dot_general(qh, kh, (((1,), (1,)), ((), ())),
                            preferred_element_type=jnp.float32)   # (tq, S)
        s = s + bias
        m = jnp.max(s, axis=-1, keepdims=True)
        if exp_dtype == jnp.float32:
            e = jnp.exp(s - m)
        else:  # bf16 EUP exp on v6e/v7x
            e = jnp.exp((s - m).astype(exp_dtype)).astype(jnp.float32)
        denom = jnp.sum(e, axis=-1, keepdims=True)
        p = e * pl.reciprocal(denom, approx=True)
        probs_ref[h] = p.astype(probs_ref.dtype)
        # per-head direct store: no concat, no cross-head vreg pressure
        ctx_ref[:, lo:lo + dk] = jnp.dot(
            p.astype(vh.dtype), vh,
            preferred_element_type=jnp.float32).astype(ctx_ref.dtype)


def multi_head_attention(qkv, mask_bias, num_heads, tq=128,
                         exp_dtype=jnp.float32, probs_dtype=jnp.bfloat16):
    # qkv: (3, B, S, D) stacked q/k/v in (B, S, D) layout (bf16); mask_bias: (B, 1, S) f32.
    _, B, S, D = qkv.shape
    dk = D // num_heads
    hg = _heads_per_group(num_heads, dk)
    gw = hg * dk
    num_groups = num_heads // hg
    tq = _tile(S, tq, 8)
    grid = (B, num_groups, S // tq)

    q_spec = pl.BlockSpec((None, None, tq, gw), lambda b, g, i: (0, b, i, g))
    k_spec = pl.BlockSpec((None, None, S, gw), lambda b, g, i: (1, b, 0, g))
    v_spec = pl.BlockSpec((None, None, S, gw), lambda b, g, i: (2, b, 0, g))
    bias_spec = pl.BlockSpec((None, 1, S), lambda b, g, i: (b, 0, 0))

    ctx, probs = pl.pallas_call(
        functools.partial(_mha_kernel, heads_per_group=hg, dk=dk,
                          exp_dtype=exp_dtype),
        out_shape=(
            jax.ShapeDtypeStruct((B, S, D), qkv.dtype),
            jax.ShapeDtypeStruct((B, num_heads, S, S), probs_dtype),
        ),
        grid=grid,
        in_specs=[q_spec, k_spec, v_spec, bias_spec],
        out_specs=(
            pl.BlockSpec((None, tq, gw), lambda b, g, i: (b, i, g)),
            pl.BlockSpec((None, hg, tq, S), lambda b, g, i: (b, g, i, 0)),
        ),
        compiler_params=pltpu.CompilerParams(
            dimension_semantics=("parallel", "parallel", "parallel"),
            vmem_limit_bytes=32 * 1024 * 1024),
    )(qkv, qkv, qkv, mask_bias)
    return ctx, probs


# ---------------------------------------------------------------------------
# Parameter prep: bf16 weights, stacked fused QKV, 1/sqrt(dk) folded into Q.
# ---------------------------------------------------------------------------
def prepare_params(p, num_heads):
    d_model = p["wq"].shape[0]
    scale = 1.0 / math.sqrt(d_model // num_heads)
    bf16 = jnp.bfloat16
    return {
        "wqkv": jnp.stack([p["wq"] * scale, p["wk"], p["wv"]], 0).astype(bf16),
        "bqkv": jnp.stack([p["bq"] * scale, p["bk"], p["bv"]], 0).astype(jnp.float32),
        "wo": p["wo"].astype(bf16), "bo": p["bo"].astype(jnp.float32),
        "w1": p["w1"].astype(bf16), "b1": p["b1"].astype(jnp.float32),
        "w2": p["w2"].astype(bf16), "b2": p["b2"].astype(jnp.float32),
        "ln1_g": p["ln1_g"].astype(jnp.float32), "ln1_b": p["ln1_b"].astype(jnp.float32),
        "ln2_g": p["ln2_g"].astype(jnp.float32), "ln2_b": p["ln2_b"].astype(jnp.float32),
    }


# ---------------------------------------------------------------------------
# Full BERT layer forward
# ---------------------------------------------------------------------------
def bert_layer_forward(x, mask, kp, num_heads):
    B, S, D = x.shape
    xf = x.reshape(B * S, D).astype(jnp.bfloat16)

    # Fused QKV projection -> (3, B, S, D); no head-split transposes.
    qkv = qkv_projection(xf, kp["wqkv"], kp["bqkv"]).reshape(3, B, S, D)

    # Additive mask bias, computed once (0 = keep, -1e9 = masked).
    mask_bias = jnp.where(mask == 0, -1e9, 0.0).astype(jnp.float32)  # (B, 1, S)

    ctx, attn_scores = multi_head_attention(qkv, mask_bias, num_heads)

    # W_o projection fused with residual add + LayerNorm 1.
    h1 = linear_add_norm(ctx.reshape(B * S, D), kp["wo"], kp["bo"],
                         xf, kp["ln1_g"], kp["ln1_b"], out_dtype=jnp.bfloat16)

    # FFN: Linear -> ReLU -> [dropout = identity in eval] -> Linear fused with AddNorm 2.
    ff = linear(h1, kp["w1"], kp["b1"], activation="relu", out_dtype=jnp.bfloat16)
    out = linear_add_norm(ff, kp["w2"], kp["b2"],
                          h1, kp["ln2_g"], kp["ln2_b"], out_dtype=jnp.float32)

    # Final dropout: identity in eval mode.
    return out.reshape(B, S, D), attn_scores


# ---------------------------------------------------------------------------
# Pure-JAX f32 reference (for correctness check)
# ---------------------------------------------------------------------------
def bert_layer_reference(x, mask, p, num_heads):
    B, S, D = x.shape
    dk = D // num_heads

    def lin(t, w, b):
        return t @ w + b[0]

    def ln(z, g, b, eps=1e-5):
        mu = jnp.mean(z, -1, keepdims=True)
        var = jnp.mean((z - mu) ** 2, -1, keepdims=True)
        return (z - mu) / jnp.sqrt(var + eps) * g[0] + b[0]

    q = lin(x, p["wq"], p["bq"]).reshape(B, S, num_heads, dk).transpose(0, 2, 1, 3)
    k = lin(x, p["wk"], p["bk"]).reshape(B, S, num_heads, dk).transpose(0, 2, 1, 3)
    v = lin(x, p["wv"], p["bv"]).reshape(B, S, num_heads, dk).transpose(0, 2, 1, 3)
    scores = jnp.einsum("bhqd,bhkd->bhqk", q, k) / math.sqrt(dk)
    scores = jnp.where(mask[:, None, :, :] == 0, -1e9, scores)
    probs = jax.nn.softmax(scores, axis=-1)
    ctx = jnp.einsum("bhqk,bhkd->bhqd", probs, v).transpose(0, 2, 1, 3).reshape(B, S, D)
    attn_out = lin(ctx, p["wo"], p["bo"])
    h1 = ln(x + attn_out, p["ln1_g"], p["ln1_b"])
    ff = lin(jnp.maximum(lin(h1, p["w1"], p["b1"]), 0.0), p["w2"], p["b2"])
    out = ln(h1 + ff, p["ln2_g"], p["ln2_b"])
    return out, probs


# ---------------------------------------------------------------------------
def init_params(key, d_model, d_ff):
    ks = jax.random.split(key, 8)
    s = 0.02
    f32 = jnp.float32
    return {
        "wq": s * jax.random.normal(ks[0], (d_model, d_model), f32),
        "bq": jnp.zeros((1, d_model), f32),
        "wk": s * jax.random.normal(ks[1], (d_model, d_model), f32),
        "bk": jnp.zeros((1, d_model), f32),
        "wv": s * jax.random.normal(ks[2], (d_model, d_model), f32),
        "bv": jnp.zeros((1, d_model), f32),
        "wo": s * jax.random.normal(ks[3], (d_model, d_model), f32),
        "bo": jnp.zeros((1, d_model), f32),
        "w1": s * jax.random.normal(ks[4], (d_model, d_ff), f32),
        "b1": jnp.zeros((1, d_ff), f32),
        "w2": s * jax.random.normal(ks[5], (d_ff, d_model), f32),
        "b2": jnp.zeros((1, d_model), f32),
        "ln1_g": jnp.ones((1, d_model), f32),
        "ln1_b": jnp.zeros((1, d_model), f32),
        "ln2_g": jnp.ones((1, d_model), f32),
        "ln2_b": jnp.zeros((1, d_model), f32),
    }


if __name__ == "__main__":
    B, S, d_model, num_heads, d_ff = 2, 8, 32, 4, 64

    key = jax.random.PRNGKey(0)
    k_x, k_p = jax.random.split(key)
    x = jax.random.normal(k_x, (B, S, d_model), jnp.float32)
    # key-padding mask: last 2 positions of batch 1 are masked out
    mask = jnp.ones((B, 1, S), jnp.int32)
    mask = mask.at[1, 0, -2:].set(0)

    params = init_params(k_p, d_model, d_ff)
    kparams = prepare_params(params, num_heads)

    out, attn_scores = jax.jit(
        functools.partial(bert_layer_forward, num_heads=num_heads)
    )(x, mask, kparams)
    out = jax.block_until_ready(out)
    attn_scores = jax.block_until_ready(attn_scores)

    ref_out, ref_probs = bert_layer_reference(x, mask, params, num_heads)
    assert out.shape == (B, S, d_model)
    assert attn_scores.shape == (B, num_heads, S, S)
    # bf16 matmul operands / bf16 probs -> relaxed tolerances vs the f32 reference.
    assert jnp.allclose(out.astype(jnp.float32), ref_out, atol=5e-2, rtol=5e-2)
    assert jnp.allclose(attn_scores.astype(jnp.float32), ref_probs,
                        atol=2e-2, rtol=2e-2)

    print("KERNEL_OK")
</pallas_src>

<mosaic_0001>
module attributes {stable_mosaic.version = 11 : i64} {
  func.func @_mha_kernel(%arg0: i32, %arg1: i32, %arg2: i32, %arg3: memref<1x1x8x32xbf16, #tpu.memory_space<vmem>>, %arg4: memref<1x1x8x32xbf16, #tpu.memory_space<vmem>>, %arg5: memref<1x1x8x32xbf16, #tpu.memory_space<vmem>>, %arg6: memref<1x1x8xf32, #tpu.memory_space<vmem>>, %arg7: memref<1x8x32xbf16, #tpu.memory_space<vmem>>, %arg8: memref<1x4x8x8xbf16, #tpu.memory_space<vmem>>) attributes {dimension_semantics = [#tpu.dimension_semantics<parallel>, #tpu.dimension_semantics<parallel>, #tpu.dimension_semantics<parallel>], iteration_bounds = array<i64: 2, 1, 1>, scalar_prefetch = 0 : i64, scratch_operands = 0 : i64, tpu.core_type = #tpu.core_type<tc>, window_params = [{transform_indices = @transform_0, window_bounds = array<i64: 1, 1, 8, 32>}, {transform_indices = @transform_1, window_bounds = array<i64: 1, 1, 8, 32>}, {transform_indices = @transform_2, window_bounds = array<i64: 1, 1, 8, 32>}, {transform_indices = @transform_3, window_bounds = array<i64: 1, 1, 8>}, {transform_indices = @transform_4, window_bounds = array<i64: 1, 8, 32>}, {transform_indices = @transform_5, window_bounds = array<i64: 1, 4, 8, 8>}]} {
    %c0 = arith.constant 0 : index
    %c0_0 = arith.constant 0 : index
    %c0_1 = arith.constant 0 : index
    %c0_2 = arith.constant 0 : index
    %0 = vector.load %arg3[%c0, %c0_0, %c0_1, %c0_2] : memref<1x1x8x32xbf16, #tpu.memory_space<vmem>>, vector<1x1x8x32xbf16>
    %1 = vector.shape_cast %0 : vector<1x1x8x32xbf16> to vector<8x32xbf16>
    %c0_3 = arith.constant 0 : index
    %c0_4 = arith.constant 0 : index
    %c0_5 = arith.constant 0 : index
    %c0_6 = arith.constant 0 : index
    %2 = vector.load %arg4[%c0_3, %c0_4, %c0_5, %c0_6] : memref<1x1x8x32xbf16, #tpu.memory_space<vmem>>, vector<1x1x8x32xbf16>
    %3 = vector.shape_cast %2 : vector<1x1x8x32xbf16> to vector<8x32xbf16>
    %c0_7 = arith.constant 0 : index
    %c0_8 = arith.constant 0 : index
    %c0_9 = arith.constant 0 : index
    %c0_10 = arith.constant 0 : index
    %4 = vector.load %arg5[%c0_7, %c0_8, %c0_9, %c0_10] : memref<1x1x8x32xbf16, #tpu.memory_space<vmem>>, vector<1x1x8x32xbf16>
    %5 = vector.shape_cast %4 : vector<1x1x8x32xbf16> to vector<8x32xbf16>
    %c0_11 = arith.constant 0 : index
    %c0_12 = arith.constant 0 : index
    %c0_13 = arith.constant 0 : index
    %6 = vector.load %arg6[%c0_11, %c0_12, %c0_13] : memref<1x1x8xf32, #tpu.memory_space<vmem>>, vector<1x1x8xf32>
    %7 = vector.shape_cast %6 : vector<1x1x8xf32> to vector<1x8xf32>
    %8 = vector.shape_cast %7 : vector<1x8xf32> to vector<1x8xf32>
    %9 = vector.broadcast %8 : vector<1x8xf32> to vector<8x8xf32>
    %10 = vector.extract_strided_slice %1 {offsets = [0, 0], sizes = [8, 8], strides = [1, 1]} : vector<8x32xbf16> to vector<8x8xbf16>
    %11 = vector.extract_strided_slice %3 {offsets = [0, 0], sizes = [8, 8], strides = [1, 1]} : vector<8x32xbf16> to vector<8x8xbf16>
    %12 = vector.extract_strided_slice %5 {offsets = [0, 0], sizes = [8, 8], strides = [1, 1]} : vector<8x32xbf16> to vector<8x8xbf16>
    %cst = arith.constant dense<0.000000e+00> : vector<8x8xf32>
    %13 = tpu.matmul %10, %11, %cst {dimension_numbers = #tpu.dot_dimension_numbers<[1], [1], [0], [0], [0, 0, 1, 0], [], []>} : vector<8x8xbf16>, vector<8x8xbf16>, vector<8x8xf32> -> vector<8x8xf32>
    %14 = arith.addf %13, %9 : vector<8x8xf32>
    %cst_14 = arith.constant dense<0xFF800000> : vector<8xf32>
    %15 = vector.multi_reduction <maximumf>, %14, %cst_14 [1] : vector<8x8xf32> to vector<8xf32>
    %16 = vector.shape_cast %15 : vector<8xf32> to vector<8x1xf32>
    %17 = vector.broadcast %16 : vector<8x1xf32> to vector<8x8xf32>
    %18 = arith.subf %14, %17 : vector<8x8xf32>
    %19 = math.exp %18 : vector<8x8xf32>
    %cst_15 = arith.constant dense<0.000000e+00> : vector<8xf32>
    %20 = vector.multi_reduction <add>, %19, %cst_15 [1] : vector<8x8xf32> to vector<8xf32>
    %21 = vector.shape_cast %20 : vector<8xf32> to vector<8x1xf32>
    %22 = tpu.reciprocal %21 {approx = true} : vector<8x1xf32> -> vector<8x1xf32>
    %23 = vector.broadcast %22 : vector<8x1xf32> to vector<8x8xf32>
    %24 = arith.mulf %19, %23 : vector<8x8xf32>
    %25 = arith.truncf %24 : vector<8x8xf32> to vector<8x8xbf16>
    %c0_16 = arith.constant 0 : index
    %c0_17 = arith.constant 0 : index
    %c0_18 = arith.constant 0 : index
    %c0_19 = arith.constant 0 : index
    %26 = vector.load %arg8[%c0_16, %c0_17, %c0_18, %c0_19] : memref<1x4x8x8xbf16, #tpu.memory_space<vmem>>, vector<1x1x8x8xbf16>
    %27 = vector.shape_cast %26 : vector<1x1x8x8xbf16> to vector<8x8xbf16>
    %28 = vector.shape_cast %25 : vector<8x8xbf16> to vector<1x1x8x8xbf16>
    tpu.vector_store %arg8[%c0_16, %c0_17, %c0_18, %c0_19], %28 {strides = array<i32>} : memref<1x4x8x8xbf16, #tpu.memory_space<vmem>>, vector<1x1x8x8xbf16>,
    %29 = arith.truncf %24 : vector<8x8xf32> to vector<8x8xbf16>
    %cst_20 = arith.constant dense<0.000000e+00> : vector<8x8xf32>
    %30 = tpu.matmul %29, %12, %cst_20 {dimension_numbers = #tpu.dot_dimension_numbers<[1], [0], [0], [1], [0, 0, 1, 1], [], []>} : vector<8x8xbf16>, vector<8x8xbf16>, vector<8x8xf32> -> vector<8x8xf32>
    %31 = arith.truncf %30 : vector<8x8xf32> to vector<8x8xbf16>
    %c0_21 = arith.constant 0 : index
    %c0_22 = arith.constant 0 : index
    %c0_23 = arith.constant 0 : index
    %32 = vector.load %arg7[%c0_21, %c0_22, %c0_23] : memref<1x8x32xbf16, #tpu.memory_space<vmem>>, vector<1x8x8xbf16>
    %33 = vector.shape_cast %32 : vector<1x8x8xbf16> to vector<8x8xbf16>
    %34 = vector.shape_cast %31 : vector<8x8xbf16> to vector<1x8x8xbf16>
    tpu.vector_store %arg7[%c0_21, %c0_22, %c0_23], %34 {strides = array<i32>} : memref<1x8x32xbf16, #tpu.memory_space<vmem>>, vector<1x8x8xbf16>,
    %35 = vector.extract_strided_slice %1 {offsets = [0, 8], sizes = [8, 8], strides = [1, 1]} : vector<8x32xbf16> to vector<8x8xbf16>
    %36 = vector.extract_strided_slice %3 {offsets = [0, 8], sizes = [8, 8], strides = [1, 1]} : vector<8x32xbf16> to vector<8x8xbf16>
    %37 = vector.extract_strided_slice %5 {offsets = [0, 8], sizes = [8, 8], strides = [1, 1]} : vector<8x32xbf16> to vector<8x8xbf16>
    %cst_24 = arith.constant dense<0.000000e+00> : vector<8x8xf32>
    %38 = tpu.matmul %35, %36, %cst_24 {dimension_numbers = #tpu.dot_dimension_numbers<[1], [1], [0], [0], [0, 0, 1, 0], [], []>} : vector<8x8xbf16>, vector<8x8xbf16>, vector<8x8xf32> -> vector<8x8xf32>
    %39 = arith.addf %38, %9 : vector<8x8xf32>
    %cst_25 = arith.constant dense<0xFF800000> : vector<8xf32>
    %40 = vector.multi_reduction <maximumf>, %39, %cst_25 [1] : vector<8x8xf32> to vector<8xf32>
    %41 = vector.shape_cast %40 : vector<8xf32> to vector<8x1xf32>
    %42 = vector.broadcast %41 : vector<8x1xf32> to vector<8x8xf32>
    %43 = arith.subf %39, %42 : vector<8x8xf32>
    %44 = math.exp %43 : vector<8x8xf32>
    %cst_26 = arith.constant dense<0.000000e+00> : vector<8xf32>
    %45 = vector.multi_reduction <add>, %44, %cst_26 [1] : vector<8x8xf32> to vector<8xf32>
    %46 = vector.shape_cast %45 : vector<8xf32> to vector<8x1xf32>
    %47 = tpu.reciprocal %46 {approx = true} : vector<8x1xf32> -> vector<8x1xf32>
    %48 = vector.broadcast %47 : vector<8x1xf32> to vector<8x8xf32>
    %49 = arith.mulf %44, %48 : vector<8x8xf32>
    %50 = arith.truncf %49 : vector<8x8xf32> to vector<8x8xbf16>
    %c0_27 = arith.constant 0 : index
    %c1 = arith.constant 1 : index
    %c0_28 = arith.constant 0 : index
    %c0_29 = arith.constant 0 : index
    %51 = vector.load %arg8[%c0_27, %c1, %c0_28, %c0_29] : memref<1x4x8x8xbf16, #tpu.memory_space<vmem>>, vector<1x1x8x8xbf16>
    %52 = vector.shape_cast %51 : vector<1x1x8x8xbf16> to vector<8x8xbf16>
    %53 = vector.shape_cast %50 : vector<8x8xbf16> to vector<1x1x8x8xbf16>
    tpu.vector_store %arg8[%c0_27, %c1, %c0_28, %c0_29], %53 {strides = array<i32>} : memref<1x4x8x8xbf16, #tpu.memory_space<vmem>>, vector<1x1x8x8xbf16>,
    %54 = arith.truncf %49 : vector<8x8xf32> to vector<8x8xbf16>
    %cst_30 = arith.constant dense<0.000000e+00> : vector<8x8xf32>
    %55 = tpu.matmul %54, %37, %cst_30 {dimension_numbers = #tpu.dot_dimension_numbers<[1], [0], [0], [1], [0, 0, 1, 1], [], []>} : vector<8x8xbf16>, vector<8x8xbf16>, vector<8x8xf32> -> vector<8x8xf32>
    %56 = arith.truncf %55 : vector<8x8xf32> to vector<8x8xbf16>
    %c0_31 = arith.constant 0 : index
    %c0_32 = arith.constant 0 : index
    %c8 = arith.constant 8 : index
    %57 = vector.load %arg7[%c0_31, %c0_32, %c8] : memref<1x8x32xbf16, #tpu.memory_space<vmem>>, vector<1x8x8xbf16>
    %58 = vector.shape_cast %57 : vector<1x8x8xbf16> to vector<8x8xbf16>
    %59 = vector.shape_cast %56 : vector<8x8xbf16> to vector<1x8x8xbf16>
    tpu.vector_store %arg7[%c0_31, %c0_32, %c8], %59 {strides = array<i32>} : memref<1x8x32xbf16, #tpu.memory_space<vmem>>, vector<1x8x8xbf16>,
    %60 = vector.extract_strided_slice %1 {offsets = [0, 16], sizes = [8, 8], strides = [1, 1]} : vector<8x32xbf16> to vector<8x8xbf16>
    %61 = vector.extract_strided_slice %3 {offsets = [0, 16], sizes = [8, 8], strides = [1, 1]} : vector<8x32xbf16> to vector<8x8xbf16>
    %62 = vector.extract_strided_slice %5 {offsets = [0, 16], sizes = [8, 8], strides = [1, 1]} : vector<8x32xbf16> to vector<8x8xbf16>
    %cst_33 = arith.constant dense<0.000000e+00> : vector<8x8xf32>
    %63 = tpu.matmul %60, %61, %cst_33 {dimension_numbers = #tpu.dot_dimension_numbers<[1], [1], [0], [0], [0, 0, 1, 0], [], []>} : vector<8x8xbf16>, vector<8x8xbf16>, vector<8x8xf32> -> vector<8x8xf32>
    %64 = arith.addf %63, %9 : vector<8x8xf32>
    %cst_34 = arith.constant dense<0xFF800000> : vector<8xf32>
    %65 = vector.multi_reduction <maximumf>, %64, %cst_34 [1] : vector<8x8xf32> to vector<8xf32>
    %66 = vector.shape_cast %65 : vector<8xf32> to vector<8x1xf32>
    %67 = vector.broadcast %66 : vector<8x1xf32> to vector<8x8xf32>
    %68 = arith.subf %64, %67 : vector<8x8xf32>
    %69 = math.exp %68 : vector<8x8xf32>
    %cst_35 = arith.constant dense<0.000000e+00> : vector<8xf32>
    %70 = vector.multi_reduction <add>, %69, %cst_35 [1] : vector<8x8xf32> to vector<8xf32>
    %71 = vector.shape_cast %70 : vector<8xf32> to vector<8x1xf32>
    %72 = tpu.reciprocal %71 {approx = true} : vector<8x1xf32> -> vector<8x1xf32>
    %73 = vector.broadcast %72 : vector<8x1xf32> to vector<8x8xf32>
    %74 = arith.mulf %69, %73 : vector<8x8xf32>
    %75 = arith.truncf %74 : vector<8x8xf32> to vector<8x8xbf16>
    %c0_36 = arith.constant 0 : index
    %c2 = arith.constant 2 : index
    %c0_37 = arith.constant 0 : index
    %c0_38 = arith.constant 0 : index
    %76 = vector.load %arg8[%c0_36, %c2, %c0_37, %c0_38] : memref<1x4x8x8xbf16, #tpu.memory_space<vmem>>, vector<1x1x8x8xbf16>
    %77 = vector.shape_cast %76 : vector<1x1x8x8xbf16> to vector<8x8xbf16>
    %78 = vector.shape_cast %75 : vector<8x8xbf16> to vector<1x1x8x8xbf16>
    tpu.vector_store %arg8[%c0_36, %c2, %c0_37, %c0_38], %78 {strides = array<i32>} : memref<1x4x8x8xbf16, #tpu.memory_space<vmem>>, vector<1x1x8x8xbf16>,
    %79 = arith.truncf %74 : vector<8x8xf32> to vector<8x8xbf16>
    %cst_39 = arith.constant dense<0.000000e+00> : vector<8x8xf32>
    %80 = tpu.matmul %79, %62, %cst_39 {dimension_numbers = #tpu.dot_dimension_numbers<[1], [0], [0], [1], [0, 0, 1, 1], [], []>} : vector<8x8xbf16>, vector<8x8xbf16>, vector<8x8xf32> -> vector<8x8xf32>
    %81 = arith.truncf %80 : vector<8x8xf32> to vector<8x8xbf16>
    %c0_40 = arith.constant 0 : index
    %c0_41 = arith.constant 0 : index
    %c16 = arith.constant 16 : index
    %82 = vector.load %arg7[%c0_40, %c0_41, %c16] : memref<1x8x32xbf16, #tpu.memory_space<vmem>>, vector<1x8x8xbf16>
    %83 = vector.shape_cast %82 : vector<1x8x8xbf16> to vector<8x8xbf16>
    %84 = vector.shape_cast %81 : vector<8x8xbf16> to vector<1x8x8xbf16>
    tpu.vector_store %arg7[%c0_40, %c0_41, %c16], %84 {strides = array<i32>} : memref<1x8x32xbf16, #tpu.memory_space<vmem>>, vector<1x8x8xbf16>,
    %85 = vector.extract_strided_slice %1 {offsets = [0, 24], sizes = [8, 8], strides = [1, 1]} : vector<8x32xbf16> to vector<8x8xbf16>
    %86 = vector.extract_strided_slice %3 {offsets = [0, 24], sizes = [8, 8], strides = [1, 1]} : vector<8x32xbf16> to vector<8x8xbf16>
    %87 = vector.extract_strided_slice %5 {offsets = [0, 24], sizes = [8, 8], strides = [1, 1]} : vector<8x32xbf16> to vector<8x8xbf16>
    %cst_42 = arith.constant dense<0.000000e+00> : vector<8x8xf32>
    %88 = tpu.matmul %85, %86, %cst_42 {dimension_numbers = #tpu.dot_dimension_numbers<[1], [1], [0], [0], [0, 0, 1, 0], [], []>} : vector<8x8xbf16>, vector<8x8xbf16>, vector<8x8xf32> -> vector<8x8xf32>
    %89 = arith.addf %88, %9 : vector<8x8xf32>
    %cst_43 = arith.constant dense<0xFF800000> : vector<8xf32>
    %90 = vector.multi_reduction <maximumf>, %89, %cst_43 [1] : vector<8x8xf32> to vector<8xf32>
    %91 = vector.shape_cast %90 : vector<8xf32> to vector<8x1xf32>
    %92 = vector.broadcast %91 : vector<8x1xf32> to vector<8x8xf32>
    %93 = arith.subf %89, %92 : vector<8x8xf32>
    %94 = math.exp %93 : vector<8x8xf32>
    %cst_44 = arith.constant dense<0.000000e+00> : vector<8xf32>
    %95 = vector.multi_reduction <add>, %94, %cst_44 [1] : vector<8x8xf32> to vector<8xf32>
    %96 = vector.shape_cast %95 : vector<8xf32> to vector<8x1xf32>
    %97 = tpu.reciprocal %96 {approx = true} : vector<8x1xf32> -> vector<8x1xf32>
    %98 = vector.broadcast %97 : vector<8x1xf32> to vector<8x8xf32>
    %99 = arith.mulf %94, %98 : vector<8x8xf32>
    %100 = arith.truncf %99 : vector<8x8xf32> to vector<8x8xbf16>
    %c0_45 = arith.constant 0 : index
    %c3 = arith.constant 3 : index
    %c0_46 = arith.constant 0 : index
    %c0_47 = arith.constant 0 : index
    %101 = vector.load %arg8[%c0_45, %c3, %c0_46, %c0_47] : memref<1x4x8x8xbf16, #tpu.memory_space<vmem>>, vector<1x1x8x8xbf16>
    %102 = vector.shape_cast %101 : vector<1x1x8x8xbf16> to vector<8x8xbf16>
    %103 = vector.shape_cast %100 : vector<8x8xbf16> to vector<1x1x8x8xbf16>
    tpu.vector_store %arg8[%c0_45, %c3, %c0_46, %c0_47], %103 {strides = array<i32>} : memref<1x4x8x8xbf16, #tpu.memory_space<vmem>>, vector<1x1x8x8xbf16>,
    %104 = arith.truncf %99 : vector<8x8xf32> to vector<8x8xbf16>
    %cst_48 = arith.constant dense<0.000000e+00> : vector<8x8xf32>
    %105 = tpu.matmul %104, %87, %cst_48 {dimension_numbers = #tpu.dot_dimension_numbers<[1], [0], [0], [1], [0, 0, 1, 1], [], []>} : vector<8x8xbf16>, vector<8x8xbf16>, vector<8x8xf32> -> vector<8x8xf32>
    %106 = arith.truncf %105 : vector<8x8xf32> to vector<8x8xbf16>
    %c0_49 = arith.constant 0 : index
    %c0_50 = arith.constant 0 : index
    %c24 = arith.constant 24 : index
    %107 = vector.load %arg7[%c0_49, %c0_50, %c24] : memref<1x8x32xbf16, #tpu.memory_space<vmem>>, vector<1x8x8xbf16>
    %108 = vector.shape_cast %107 : vector<1x8x8xbf16> to vector<8x8xbf16>
    %109 = vector.shape_cast %106 : vector<8x8xbf16> to vector<1x8x8xbf16>
    tpu.vector_store %arg7[%c0_49, %c0_50, %c24], %109 {strides = array<i32>} : memref<1x8x32xbf16, #tpu.memory_space<vmem>>, vector<1x8x8xbf16>,
    return
  }
  func.func @transform_0(%arg0: i32, %arg1: i32, %arg2: i32) -> (i32, i32, i32, i32) {
    %c0_i32 = arith.constant 0 : i32
    %c0_i32_0 = arith.constant 0 : i32
    return %c0_i32, %arg0, %arg2, %arg1 : i32, i32, i32, i32
  }
  func.func @transform_1(%arg0: i32, %arg1: i32, %arg2: i32) -> (i32, i32, i32, i32) {
    %c1_i32 = arith.constant 1 : i32
    %c0_i32 = arith.constant 0 : i32
    %c0_i32_0 = arith.constant 0 : i32
    return %c1_i32, %arg0, %c0_i32, %arg1 : i32, i32, i32, i32
  }
  func.func @transform_2(%arg0: i32, %arg1: i32, %arg2: i32) -> (i32, i32, i32, i32) {
    %c2_i32 = arith.constant 2 : i32
    %c0_i32 = arith.constant 0 : i32
    %c0_i32_0 = arith.constant 0 : i32
    return %c2_i32, %arg0, %c0_i32, %arg1 : i32, i32, i32, i32
  }
  func.func @transform_3(%arg0: i32, %arg1: i32, %arg2: i32) -> (i32, i32, i32) {
    %c0_i32 = arith.constant 0 : i32
    %c0_i32_0 = arith.constant 0 : i32
    %c0_i32_1 = arith.constant 0 : i32
    return %arg0, %c0_i32, %c0_i32_0 : i32, i32, i32
  }
  func.func @transform_4(%arg0: i32, %arg1: i32, %arg2: i32) -> (i32, i32, i32) {
    %c0_i32 = arith.constant 0 : i32
    return %arg0, %arg2, %arg1 : i32, i32, i32
  }
  func.func @transform_5(%arg0: i32, %arg1: i32, %arg2: i32) -> (i32, i32, i32, i32) {
    %c0_i32 = arith.constant 0 : i32
    %c0_i32_0 = arith.constant 0 : i32
    return %arg0, %arg1, %arg2, %c0_i32 : i32, i32, i32, i32
  }
}

module attributes {stable_mosaic.version = 11 : i64} {
  func.func @_matmul_kernel(%arg0: i32, %arg1: i32, %arg2: i32, %arg3: memref<16x32xbf16, #tpu.memory_space<vmem>>, %arg4: memref<1x32x32xbf16, #tpu.memory_space<vmem>>, %arg5: memref<1x1x32xf32, #tpu.memory_space<vmem>>, %arg6: memref<1x16x32xbf16, #tpu.memory_space<vmem>>, %arg7: memref<16x32xf32, #tpu.memory_space<vmem>>) attributes {dimension_semantics = [#tpu.dimension_semantics<parallel>, #tpu.dimension_semantics<parallel>, #tpu.dimension_semantics<arbitrary>], iteration_bounds = array<i64: 1, 3, 1>, scalar_prefetch = 0 : i64, scratch_operands = 1 : i64, tpu.core_type = #tpu.core_type<tc>, window_params = [{transform_indices = @transform_0, window_bounds = array<i64: 16, 32>}, {transform_indices = @transform_1, window_bounds = array<i64: 1, 32, 32>}, {transform_indices = @transform_2, window_bounds = array<i64: 1, 1, 32>}, {transform_indices = @transform_3, window_bounds = array<i64: 1, 16, 32>}]} {
    %c0_i32 = arith.constant 0 : i32
    %0 = arith.cmpi eq, %arg2, %c0_i32 : i32
    %1 = arith.extui %0 : i1 to i32
    %c0_i32_0 = arith.constant 0 : i32
    %2 = arith.cmpi ne, %1, %c0_i32_0 : i32
    scf.if %2 {
      %cst_11 = arith.constant 0.000000e+00 : f32
      %13 = vector.broadcast %cst_11 : f32 to vector<16x32xf32>
      %c0_12 = arith.constant 0 : index
      %c0_13 = arith.constant 0 : index
      %14 = vector.load %arg7[%c0_12, %c0_13] : memref<16x32xf32, #tpu.memory_space<vmem>>, vector<16x32xf32>
      tpu.vector_store %arg7[%c0_12, %c0_13], %13 {strides = array<i32>} : memref<16x32xf32, #tpu.memory_space<vmem>>, vector<16x32xf32>,
    } else {
    }
    %c0 = arith.constant 0 : index
    %c0_1 = arith.constant 0 : index
    %3 = vector.load %arg7[%c0, %c0_1] : memref<16x32xf32, #tpu.memory_space<vmem>>, vector<16x32xf32>
    %c0_2 = arith.constant 0 : index
    %c0_3 = arith.constant 0 : index
    %4 = vector.load %arg3[%c0_2, %c0_3] : memref<16x32xbf16, #tpu.memory_space<vmem>>, vector<16x32xbf16>
    %c0_4 = arith.constant 0 : index
    %c0_5 = arith.constant 0 : index
    %c0_6 = arith.constant 0 : index
    %5 = vector.load %arg4[%c0_4, %c0_5, %c0_6] : memref<1x32x32xbf16, #tpu.memory_space<vmem>>, vector<1x32x32xbf16>
    %6 = vector.shape_cast %5 : vector<1x32x32xbf16> to vector<32x32xbf16>
    %cst = arith.constant dense<0.000000e+00> : vector<16x32xf32>
    %7 = tpu.matmul %4, %6, %cst {dimension_numbers = #tpu.dot_dimension_numbers<[1], [0], [0], [1], [0, 0, 1, 1], [], []>} : vector<16x32xbf16>, vector<32x32xbf16>, vector<16x32xf32> -> vector<16x32xf32>
    %8 = arith.addf %3, %7 : vector<16x32xf32>
    %c0_7 = arith.constant 0 : index
    %c0_8 = arith.constant 0 : index
    %9 = vector.load %arg7[%c0_7, %c0_8] : memref<16x32xf32, #tpu.memory_space<vmem>>, vector<16x32xf32>
    tpu.vector_store %arg7[%c0_7, %c0_8], %8 {strides = array<i32>} : memref<16x32xf32, #tpu.memory_space<vmem>>, vector<16x32xf32>,
    %c0_i32_9 = arith.constant 0 : i32
    %10 = arith.cmpi eq, %arg2, %c0_i32_9 : i32
    %11 = arith.extui %10 : i1 to i32
    %c0_i32_10 = arith.constant 0 : i32
    %12 = arith.cmpi ne, %11, %c0_i32_10 : i32
    scf.if %12 {
      %c0_11 = arith.constant 0 : index
      %c0_12 = arith.constant 0 : index
      %13 = vector.load %arg7[%c0_11, %c0_12] : memref<16x32xf32, #tpu.memory_space<vmem>>, vector<16x32xf32>
      %c0_13 = arith.constant 0 : index
      %c0_14 = arith.constant 0 : index
      %c0_15 = arith.constant 0 : index
      %14 = vector.load %arg5[%c0_13, %c0_14, %c0_15] : memref<1x1x32xf32, #tpu.memory_space<vmem>>, vector<1x1x32xf32>
      %15 = vector.shape_cast %14 : vector<1x1x32xf32> to vector<1x32xf32>
      %16 = vector.broadcast %15 : vector<1x32xf32> to vector<16x32xf32>
      %17 = arith.addf %13, %16 : vector<16x32xf32>
      %18 = arith.truncf %17 : vector<16x32xf32> to vector<16x32xbf16>
      %c0_16 = arith.constant 0 : index
      %c0_17 = arith.constant 0 : index
      %c0_18 = arith.constant 0 : index
      %19 = vector.load %arg6[%c0_16, %c0_17, %c0_18] : memref<1x16x32xbf16, #tpu.memory_space<vmem>>, vector<1x16x32xbf16>
      %20 = vector.shape_cast %19 : vector<1x16x32xbf16> to vector<16x32xbf16>
      %21 = vector.shape_cast %18 : vector<16x32xbf16> to vector<1x16x32xbf16>
      tpu.vector_store %arg6[%c0_16, %c0_17, %c0_18], %21 {strides = array<i32>} : memref<1x16x32xbf16, #tpu.memory_space<vmem>>, vector<1x16x32xbf16>,
    } else {
    }
    return
  }
  func.func @transform_0(%arg0: i32, %arg1: i32, %arg2: i32) -> (i32, i32) {
    %c0_i32 = arith.constant 0 : i32
    return %arg0, %arg2 : i32, i32
  }
  func.func @transform_1(%arg0: i32, %arg1: i32, %arg2: i32) -> (i32, i32, i32) {
    %c0_i32 = arith.constant 0 : i32
    %c0_i32_0 = arith.constant 0 : i32
    return %arg1, %arg2, %c0_i32 : i32, i32, i32
  }
  func.func @transform_2(%arg0: i32, %arg1: i32, %arg2: i32) -> (i32, i32, i32) {
    %c0_i32 = arith.constant 0 : i32
    %c0_i32_0 = arith.constant 0 : i32
    %c0_i32_1 = arith.constant 0 : i32
    return %arg1, %c0_i32, %c0_i32_0 : i32, i32, i32
  }
  func.func @transform_3(%arg0: i32, %arg1: i32, %arg2: i32) -> (i32, i32, i32) {
    %c0_i32 = arith.constant 0 : i32
    %c0_i32_0 = arith.constant 0 : i32
    return %arg1, %arg0, %c0_i32 : i32, i32, i32
  }
}

module attributes {stable_mosaic.version = 11 : i64} {
  func.func @_matmul_add_norm_kernel(%arg0: i32, %arg1: i32, %arg2: memref<16x32xbf16, #tpu.memory_space<vmem>>, %arg3: memref<32x32xbf16, #tpu.memory_space<vmem>>, %arg4: memref<1x32xf32, #tpu.memory_space<vmem>>, %arg5: memref<16x32xbf16, #tpu.memory_space<vmem>>, %arg6: memref<1x32xf32, #tpu.memory_space<vmem>>, %arg7: memref<1x32xf32, #tpu.memory_space<vmem>>, %arg8: memref<16x32xbf16, #tpu.memory_space<vmem>>, %arg9: memref<16x32xf32, #tpu.memory_space<vmem>>) attributes {dimension_semantics = [#tpu.dimension_semantics<parallel>, #tpu.dimension_semantics<arbitrary>], iteration_bounds = array<i64: 1, 1>, scalar_prefetch = 0 : i64, scratch_operands = 1 : i64, tpu.core_type = #tpu.core_type<tc>, window_params = [{transform_indices = @transform_0, window_bounds = array<i64: 16, 32>}, {transform_indices = @transform_1, window_bounds = array<i64: 32, 32>}, {pipeline_mode = #tpu.pipeline_mode<synchronous>, transform_indices = @transform_2, window_bounds = array<i64: 1, 32>}, {transform_indices = @transform_3, window_bounds = array<i64: 16, 32>}, {pipeline_mode = #tpu.pipeline_mode<synchronous>, transform_indices = @transform_4, window_bounds = array<i64: 1, 32>}, {pipeline_mode = #tpu.pipeline_mode<synchronous>, transform_indices = @transform_5, window_bounds = array<i64: 1, 32>}, {transform_indices = @transform_6, window_bounds = array<i64: 16, 32>}]} {
    %c0_i32 = arith.constant 0 : i32
    %0 = arith.cmpi eq, %arg1, %c0_i32 : i32
    %1 = arith.extui %0 : i1 to i32
    %c0_i32_0 = arith.constant 0 : i32
    %2 = arith.cmpi ne, %1, %c0_i32_0 : i32
    scf.if %2 {
      %cst_10 = arith.constant 0.000000e+00 : f32
      %12 = vector.broadcast %cst_10 : f32 to vector<16x32xf32>
      %c0_11 = arith.constant 0 : index
      %c0_12 = arith.constant 0 : index
      %13 = vector.load %arg9[%c0_11, %c0_12] : memref<16x32xf32, #tpu.memory_space<vmem>>, vector<16x32xf32>
      tpu.vector_store %arg9[%c0_11, %c0_12], %12 {strides = array<i32>} : memref<16x32xf32, #tpu.memory_space<vmem>>, vector<16x32xf32>,
    } else {
    }
    %c0 = arith.constant 0 : index
    %c0_1 = arith.constant 0 : index
    %3 = vector.load %arg9[%c0, %c0_1] : memref<16x32xf32, #tpu.memory_space<vmem>>, vector<16x32xf32>
    %c0_2 = arith.constant 0 : index
    %c0_3 = arith.constant 0 : index
    %4 = vector.load %arg2[%c0_2, %c0_3] : memref<16x32xbf16, #tpu.memory_space<vmem>>, vector<16x32xbf16>
    %c0_4 = arith.constant 0 : index
    %c0_5 = arith.constant 0 : index
    %5 = vector.load %arg3[%c0_4, %c0_5] : memref<32x32xbf16, #tpu.memory_space<vmem>>, vector<32x32xbf16>
    %cst = arith.constant dense<0.000000e+00> : vector<16x32xf32>
    %6 = tpu.matmul %4, %5, %cst {dimension_numbers = #tpu.dot_dimension_numbers<[1], [0], [0], [1], [0, 0, 1, 1], [], []>} : vector<16x32xbf16>, vector<32x32xbf16>, vector<16x32xf32> -> vector<16x32xf32>
    %7 = arith.addf %3, %6 : vector<16x32xf32>
    %c0_6 = arith.constant 0 : index
    %c0_7 = arith.constant 0 : index
    %8 = vector.load %arg9[%c0_6, %c0_7] : memref<16x32xf32, #tpu.memory_space<vmem>>, vector<16x32xf32>
    tpu.vector_store %arg9[%c0_6, %c0_7], %7 {strides = array<i32>} : memref<16x32xf32, #tpu.memory_space<vmem>>, vector<16x32xf32>,
    %c0_i32_8 = arith.constant 0 : i32
    %9 = arith.cmpi eq, %arg1, %c0_i32_8 : i32
    %10 = arith.extui %9 : i1 to i32
    %c0_i32_9 = arith.constant 0 : i32
    %11 = arith.cmpi ne, %10, %c0_i32_9 : i32
    scf.if %11 {
      %c0_10 = arith.constant 0 : index
      %c0_11 = arith.constant 0 : index
      %12 = vector.load %arg9[%c0_10, %c0_11] : memref<16x32xf32, #tpu.memory_space<vmem>>, vector<16x32xf32>
      %c0_12 = arith.constant 0 : index
      %c0_13 = arith.constant 0 : index
      %13 = vector.load %arg4[%c0_12, %c0_13] : memref<1x32xf32, #tpu.memory_space<vmem>>, vector<1x32xf32>
      %14 = vector.broadcast %13 : vector<1x32xf32> to vector<16x32xf32>
      %15 = arith.addf %12, %14 : vector<16x32xf32>
      %c0_14 = arith.constant 0 : index
      %c0_15 = arith.constant 0 : index
      %16 = vector.load %arg5[%c0_14, %c0_15] : memref<16x32xbf16, #tpu.memory_space<vmem>>, vector<16x32xbf16>
      %17 = arith.extf %16 : vector<16x32xbf16> to vector<16x32xf32>
      %18 = arith.addf %15, %17 : vector<16x32xf32>
      %cst_16 = arith.constant dense<0.000000e+00> : vector<16xf32>
      %19 = vector.multi_reduction <add>, %18, %cst_16 [1] : vector<16x32xf32> to vector<16xf32>
      %20 = vector.shape_cast %19 : vector<16xf32> to vector<16x1xf32>
      %cst_17 = arith.constant 3.200000e+01 : f32
      %21 = vector.broadcast %cst_17 : f32 to vector<16x1xf32>
      %22 = arith.divf %20, %21 : vector<16x1xf32>
      %23 = vector.broadcast %22 : vector<16x1xf32> to vector<16x32xf32>
      %24 = arith.subf %18, %23 : vector<16x32xf32>
      %25 = arith.mulf %24, %24 : vector<16x32xf32>
      %cst_18 = arith.constant dense<0.000000e+00> : vector<16xf32>
      %26 = vector.multi_reduction <add>, %25, %cst_18 [1] : vector<16x32xf32> to vector<16xf32>
      %27 = vector.shape_cast %26 : vector<16xf32> to vector<16x1xf32>
      %cst_19 = arith.constant 3.200000e+01 : f32
      %28 = vector.broadcast %cst_19 : f32 to vector<16x1xf32>
      %29 = arith.divf %27, %28 : vector<16x1xf32>
      %30 = vector.broadcast %22 : vector<16x1xf32> to vector<16x32xf32>
      %31 = arith.subf %18, %30 : vector<16x32xf32>
      %cst_20 = arith.constant 9.99999974E-6 : f32
      %32 = vector.broadcast %cst_20 : f32 to vector<16x1xf32>
      %33 = arith.addf %29, %32 : vector<16x1xf32>
      %34 = math.rsqrt %33 : vector<16x1xf32>
      %35 = vector.broadcast %34 : vector<16x1xf32> to vector<16x32xf32>
      %36 = arith.mulf %31, %35 : vector<16x32xf32>
      %c0_21 = arith.constant 0 : index
      %c0_22 = arith.constant 0 : index
      %37 = vector.load %arg6[%c0_21, %c0_22] : memref<1x32xf32, #tpu.memory_space<vmem>>, vector<1x32xf32>
      %38 = vector.broadcast %37 : vector<1x32xf32> to vector<16x32xf32>
      %39 = arith.mulf %36, %38 : vector<16x32xf32>
      %c0_23 = arith.constant 0 : index
      %c0_24 = arith.constant 0 : index
      %40 = vector.load %arg7[%c0_23, %c0_24] : memref<1x32xf32, #tpu.memory_space<vmem>>, vector<1x32xf32>
      %41 = vector.broadcast %40 : vector<1x32xf32> to vector<16x32xf32>
      %42 = arith.addf %39, %41 : vector<16x32xf32>
      %43 = arith.truncf %42 : vector<16x32xf32> to vector<16x32xbf16>
      %c0_25 = arith.constant 0 : index
      %c0_26 = arith.constant 0 : index
      %44 = vector.load %arg8[%c0_25, %c0_26] : memref<16x32xbf16, #tpu.memory_space<vmem>>, vector<16x32xbf16>
      tpu.vector_store %arg8[%c0_25, %c0_26], %43 {strides = array<i32>} : memref<16x32xbf16, #tpu.memory_space<vmem>>, vector<16x32xbf16>,
    } else {
    }
    return
  }
  func.func @transform_0(%arg0: i32, %arg1: i32) -> (i32, i32) {
    %c0_i32 = arith.constant 0 : i32
    return %arg0, %arg1 : i32, i32
  }
  func.func @transform_1(%arg0: i32, %arg1: i32) -> (i32, i32) {
    %c0_i32 = arith.constant 0 : i32
    %c0_i32_0 = arith.constant 0 : i32
    return %arg1, %c0_i32 : i32, i32
  }
  func.func @transform_2(%arg0: i32, %arg1: i32) -> (i32, i32) {
    %c0_i32 = arith.constant 0 : i32
    %c0_i32_0 = arith.constant 0 : i32
    %c0_i32_1 = arith.constant 0 : i32
    return %c0_i32, %c0_i32_0 : i32, i32
  }
  func.func @transform_3(%arg0: i32, %arg1: i32) -> (i32, i32) {
    %c0_i32 = arith.constant 0 : i32
    %c0_i32_0 = arith.constant 0 : i32
    return %arg0, %c0_i32 : i32, i32
  }
  func.func @transform_4(%arg0: i32, %arg1: i32) -> (i32, i32) {
    %c0_i32 = arith.constant 0 : i32
    %c0_i32_0 = arith.constant 0 : i32
    %c0_i32_1 = arith.constant 0 : i32
    return %c0_i32, %c0_i32_0 : i32, i32
  }
  func.func @transform_5(%arg0: i32, %arg1: i32) -> (i32, i32) {
    %c0_i32 = arith.constant 0 : i32
    %c0_i32_0 = arith.constant 0 : i32
    %c0_i32_1 = arith.constant 0 : i32
    return %c0_i32, %c0_i32_0 : i32, i32
  }
  func.func @transform_6(%arg0: i32, %arg1: i32) -> (i32, i32) {
    %c0_i32 = arith.constant 0 : i32
    %c0_i32_0 = arith.constant 0 : i32
    return %arg0, %c0_i32 : i32, i32
  }
}

module attributes {stable_mosaic.version = 11 : i64} {
  func.func @_matmul_kernel(%arg0: i32, %arg1: i32, %arg2: i32, %arg3: memref<16x32xbf16, #tpu.memory_space<vmem>>, %arg4: memref<32x64xbf16, #tpu.memory_space<vmem>>, %arg5: memref<1x64xf32, #tpu.memory_space<vmem>>, %arg6: memref<16x64xbf16, #tpu.memory_space<vmem>>, %arg7: memref<16x64xf32, #tpu.memory_space<vmem>>) attributes {dimension_semantics = [#tpu.dimension_semantics<parallel>, #tpu.dimension_semantics<parallel>, #tpu.dimension_semantics<arbitrary>], iteration_bounds = array<i64: 1, 1, 1>, scalar_prefetch = 0 : i64, scratch_operands = 1 : i64, tpu.core_type = #tpu.core_type<tc>, window_params = [{transform_indices = @transform_0, window_bounds = array<i64: 16, 32>}, {transform_indices = @transform_1, window_bounds = array<i64: 32, 64>}, {transform_indices = @transform_2, window_bounds = array<i64: 1, 64>}, {transform_indices = @transform_3, window_bounds = array<i64: 16, 64>}]} {
    %c0_i32 = arith.constant 0 : i32
    %0 = arith.cmpi eq, %arg2, %c0_i32 : i32
    %1 = arith.extui %0 : i1 to i32
    %c0_i32_0 = arith.constant 0 : i32
    %2 = arith.cmpi ne, %1, %c0_i32_0 : i32
    scf.if %2 {
      %cst_10 = arith.constant 0.000000e+00 : f32
      %12 = vector.broadcast %cst_10 : f32 to vector<16x64xf32>
      %c0_11 = arith.constant 0 : index
      %c0_12 = arith.constant 0 : index
      %13 = vector.load %arg7[%c0_11, %c0_12] : memref<16x64xf32, #tpu.memory_space<vmem>>, vector<16x64xf32>
      tpu.vector_store %arg7[%c0_11, %c0_12], %12 {strides = array<i32>} : memref<16x64xf32, #tpu.memory_space<vmem>>, vector<16x64xf32>,
    } else {
    }
    %c0 = arith.constant 0 : index
    %c0_1 = arith.constant 0 : index
    %3 = vector.load %arg7[%c0, %c0_1] : memref<16x64xf32, #tpu.memory_space<vmem>>, vector<16x64xf32>
    %c0_2 = arith.constant 0 : index
    %c0_3 = arith.constant 0 : index
    %4 = vector.load %arg3[%c0_2, %c0_3] : memref<16x32xbf16, #tpu.memory_space<vmem>>, vector<16x32xbf16>
    %c0_4 = arith.constant 0 : index
    %c0_5 = arith.constant 0 : index
    %5 = vector.load %arg4[%c0_4, %c0_5] : memref<32x64xbf16, #tpu.memory_space<vmem>>, vector<32x64xbf16>
    %cst = arith.constant dense<0.000000e+00> : vector<16x64xf32>
    %6 = tpu.matmul %4, %5, %cst {dimension_numbers = #tpu.dot_dimension_numbers<[1], [0], [0], [1], [0, 0, 1, 1], [], []>} : vector<16x32xbf16>, vector<32x64xbf16>, vector<16x64xf32> -> vector<16x64xf32>
    %7 = arith.addf %3, %6 : vector<16x64xf32>
    %c0_6 = arith.constant 0 : index
    %c0_7 = arith.constant 0 : index
    %8 = vector.load %arg7[%c0_6, %c0_7] : memref<16x64xf32, #tpu.memory_space<vmem>>, vector<16x64xf32>
    tpu.vector_store %arg7[%c0_6, %c0_7], %7 {strides = array<i32>} : memref<16x64xf32, #tpu.memory_space<vmem>>, vector<16x64xf32>,
    %c0_i32_8 = arith.constant 0 : i32
    %9 = arith.cmpi eq, %arg2, %c0_i32_8 : i32
    %10 = arith.extui %9 : i1 to i32
    %c0_i32_9 = arith.constant 0 : i32
    %11 = arith.cmpi ne, %10, %c0_i32_9 : i32
    scf.if %11 {
      %c0_10 = arith.constant 0 : index
      %c0_11 = arith.constant 0 : index
      %12 = vector.load %arg7[%c0_10, %c0_11] : memref<16x64xf32, #tpu.memory_space<vmem>>, vector<16x64xf32>
      %c0_12 = arith.constant 0 : index
      %c0_13 = arith.constant 0 : index
      %13 = vector.load %arg5[%c0_12, %c0_13] : memref<1x64xf32, #tpu.memory_space<vmem>>, vector<1x64xf32>
      %14 = vector.broadcast %13 : vector<1x64xf32> to vector<16x64xf32>
      %15 = arith.addf %12, %14 : vector<16x64xf32>
      %cst_14 = arith.constant 0.000000e+00 : f32
      %16 = vector.broadcast %cst_14 : f32 to vector<16x64xf32>
      %17 = arith.maximumf %15, %16 : vector<16x64xf32>
      %18 = arith.truncf %17 : vector<16x64xf32> to vector<16x64xbf16>
      %c0_15 = arith.constant 0 : index
      %c0_16 = arith.constant 0 : index
      %19 = vector.load %arg6[%c0_15, %c0_16] : memref<16x64xbf16, #tpu.memory_space<vmem>>, vector<16x64xbf16>
      tpu.vector_store %arg6[%c0_15, %c0_16], %18 {strides = array<i32>} : memref<16x64xbf16, #tpu.memory_space<vmem>>, vector<16x64xbf16>,
    } else {
    }
    return
  }
  func.func @transform_0(%arg0: i32, %arg1: i32, %arg2: i32) -> (i32, i32) {
    %c0_i32 = arith.constant 0 : i32
    return %arg0, %arg2 : i32, i32
  }
  func.func @transform_1(%arg0: i32, %arg1: i32, %arg2: i32) -> (i32, i32) {
    %c0_i32 = arith.constant 0 : i32
    return %arg2, %arg1 : i32, i32
  }
  func.func @transform_2(%arg0: i32, %arg1: i32, %arg2: i32) -> (i32, i32) {
    %c0_i32 = arith.constant 0 : i32
    %c0_i32_0 = arith.constant 0 : i32
    return %c0_i32, %arg1 : i32, i32
  }
  func.func @transform_3(%arg0: i32, %arg1: i32, %arg2: i32) -> (i32, i32) {
    %c0_i32 = arith.constant 0 : i32
    return %arg0, %arg1 : i32, i32
  }
}

module attributes {stable_mosaic.version = 11 : i64} {
  func.func @_matmul_add_norm_kernel(%arg0: i32, %arg1: i32, %arg2: memref<16x64xbf16, #tpu.memory_space<vmem>>, %arg3: memref<64x32xbf16, #tpu.memory_space<vmem>>, %arg4: memref<1x32xf32, #tpu.memory_space<vmem>>, %arg5: memref<16x32xbf16, #tpu.memory_space<vmem>>, %arg6: memref<1x32xf32, #tpu.memory_space<vmem>>, %arg7: memref<1x32xf32, #tpu.memory_space<vmem>>, %arg8: memref<16x32xf32, #tpu.memory_space<vmem>>, %arg9: memref<16x32xf32, #tpu.memory_space<vmem>>) attributes {dimension_semantics = [#tpu.dimension_semantics<parallel>, #tpu.dimension_semantics<arbitrary>], iteration_bounds = array<i64: 1, 1>, scalar_prefetch = 0 : i64, scratch_operands = 1 : i64, tpu.core_type = #tpu.core_type<tc>, window_params = [{transform_indices = @transform_0, window_bounds = array<i64: 16, 64>}, {transform_indices = @transform_1, window_bounds = array<i64: 64, 32>}, {pipeline_mode = #tpu.pipeline_mode<synchronous>, transform_indices = @transform_2, window_bounds = array<i64: 1, 32>}, {transform_indices = @transform_3, window_bounds = array<i64: 16, 32>}, {pipeline_mode = #tpu.pipeline_mode<synchronous>, transform_indices = @transform_4, window_bounds = array<i64: 1, 32>}, {pipeline_mode = #tpu.pipeline_mode<synchronous>, transform_indices = @transform_5, window_bounds = array<i64: 1, 32>}, {transform_indices = @transform_6, window_bounds = array<i64: 16, 32>}]} {
    %c0_i32 = arith.constant 0 : i32
    %0 = arith.cmpi eq, %arg1, %c0_i32 : i32
    %1 = arith.extui %0 : i1 to i32
    %c0_i32_0 = arith.constant 0 : i32
    %2 = arith.cmpi ne, %1, %c0_i32_0 : i32
    scf.if %2 {
      %cst_10 = arith.constant 0.000000e+00 : f32
      %12 = vector.broadcast %cst_10 : f32 to vector<16x32xf32>
      %c0_11 = arith.constant 0 : index
      %c0_12 = arith.constant 0 : index
      %13 = vector.load %arg9[%c0_11, %c0_12] : memref<16x32xf32, #tpu.memory_space<vmem>>, vector<16x32xf32>
      tpu.vector_store %arg9[%c0_11, %c0_12], %12 {strides = array<i32>} : memref<16x32xf32, #tpu.memory_space<vmem>>, vector<16x32xf32>,
    } else {
    }
    %c0 = arith.constant 0 : index
    %c0_1 = arith.constant 0 : index
    %3 = vector.load %arg9[%c0, %c0_1] : memref<16x32xf32, #tpu.memory_space<vmem>>, vector<16x32xf32>
    %c0_2 = arith.constant 0 : index
    %c0_3 = arith.constant 0 : index
    %4 = vector.load %arg2[%c0_2, %c0_3] : memref<16x64xbf16, #tpu.memory_space<vmem>>, vector<16x64xbf16>
    %c0_4 = arith.constant 0 : index
    %c0_5 = arith.constant 0 : index
    %5 = vector.load %arg3[%c0_4, %c0_5] : memref<64x32xbf16, #tpu.memory_space<vmem>>, vector<64x32xbf16>
    %cst = arith.constant dense<0.000000e+00> : vector<16x32xf32>
    %6 = tpu.matmul %4, %5, %cst {dimension_numbers = #tpu.dot_dimension_numbers<[1], [0], [0], [1], [0, 0, 1, 1], [], []>} : vector<16x64xbf16>, vector<64x32xbf16>, vector<16x32xf32> -> vector<16x32xf32>
    %7 = arith.addf %3, %6 : vector<16x32xf32>
    %c0_6 = arith.constant 0 : index
    %c0_7 = arith.constant 0 : index
    %8 = vector.load %arg9[%c0_6, %c0_7] : memref<16x32xf32, #tpu.memory_space<vmem>>, vector<16x32xf32>
    tpu.vector_store %arg9[%c0_6, %c0_7], %7 {strides = array<i32>} : memref<16x32xf32, #tpu.memory_space<vmem>>, vector<16x32xf32>,
    %c0_i32_8 = arith.constant 0 : i32
    %9 = arith.cmpi eq, %arg1, %c0_i32_8 : i32
    %10 = arith.extui %9 : i1 to i32
    %c0_i32_9 = arith.constant 0 : i32
    %11 = arith.cmpi ne, %10, %c0_i32_9 : i32
    scf.if %11 {
      %c0_10 = arith.constant 0 : index
      %c0_11 = arith.constant 0 : index
      %12 = vector.load %arg9[%c0_10, %c0_11] : memref<16x32xf32, #tpu.memory_space<vmem>>, vector<16x32xf32>
      %c0_12 = arith.constant 0 : index
      %c0_13 = arith.constant 0 : index
      %13 = vector.load %arg4[%c0_12, %c0_13] : memref<1x32xf32, #tpu.memory_space<vmem>>, vector<1x32xf32>
      %14 = vector.broadcast %13 : vector<1x32xf32> to vector<16x32xf32>
      %15 = arith.addf %12, %14 : vector<16x32xf32>
      %c0_14 = arith.constant 0 : index
      %c0_15 = arith.constant 0 : index
      %16 = vector.load %arg5[%c0_14, %c0_15] : memref<16x32xbf16, #tpu.memory_space<vmem>>, vector<16x32xbf16>
      %17 = arith.extf %16 : vector<16x32xbf16> to vector<16x32xf32>
      %18 = arith.addf %15, %17 : vector<16x32xf32>
      %cst_16 = arith.constant dense<0.000000e+00> : vector<16xf32>
      %19 = vector.multi_reduction <add>, %18, %cst_16 [1] : vector<16x32xf32> to vector<16xf32>
      %20 = vector.shape_cast %19 : vector<16xf32> to vector<16x1xf32>
      %cst_17 = arith.constant 3.200000e+01 : f32
      %21 = vector.broadcast %cst_17 : f32 to vector<16x1xf32>
      %22 = arith.divf %20, %21 : vector<16x1xf32>
      %23 = vector.broadcast %22 : vector<16x1xf32> to vector<16x32xf32>
      %24 = arith.subf %18, %23 : vector<16x32xf32>
      %25 = arith.mulf %24, %24 : vector<16x32xf32>
      %cst_18 = arith.constant dense<0.000000e+00> : vector<16xf32>
      %26 = vector.multi_reduction <add>, %25, %cst_18 [1] : vector<16x32xf32> to vector<16xf32>
      %27 = vector.shape_cast %26 : vector<16xf32> to vector<16x1xf32>
      %cst_19 = arith.constant 3.200000e+01 : f32
      %28 = vector.broadcast %cst_19 : f32 to vector<16x1xf32>
      %29 = arith.divf %27, %28 : vector<16x1xf32>
      %30 = vector.broadcast %22 : vector<16x1xf32> to vector<16x32xf32>
      %31 = arith.subf %18, %30 : vector<16x32xf32>
      %cst_20 = arith.constant 9.99999974E-6 : f32
      %32 = vector.broadcast %cst_20 : f32 to vector<16x1xf32>
      %33 = arith.addf %29, %32 : vector<16x1xf32>
      %34 = math.rsqrt %33 : vector<16x1xf32>
      %35 = vector.broadcast %34 : vector<16x1xf32> to vector<16x32xf32>
      %36 = arith.mulf %31, %35 : vector<16x32xf32>
      %c0_21 = arith.constant 0 : index
      %c0_22 = arith.constant 0 : index
      %37 = vector.load %arg6[%c0_21, %c0_22] : memref<1x32xf32, #tpu.memory_space<vmem>>, vector<1x32xf32>
      %38 = vector.broadcast %37 : vector<1x32xf32> to vector<16x32xf32>
      %39 = arith.mulf %36, %38 : vector<16x32xf32>
      %c0_23 = arith.constant 0 : index
      %c0_24 = arith.constant 0 : index
      %40 = vector.load %arg7[%c0_23, %c0_24] : memref<1x32xf32, #tpu.memory_space<vmem>>, vector<1x32xf32>
      %41 = vector.broadcast %40 : vector<1x32xf32> to vector<16x32xf32>
      %42 = arith.addf %39, %41 : vector<16x32xf32>
      %c0_25 = arith.constant 0 : index
      %c0_26 = arith.constant 0 : index
      %43 = vector.load %arg8[%c0_25, %c0_26] : memref<16x32xf32, #tpu.memory_space<vmem>>, vector<16x32xf32>
      tpu.vector_store %arg8[%c0_25, %c0_26], %42 {strides = array<i32>} : memref<16x32xf32, #tpu.memory_space<vmem>>, vector<16x32xf32>,
    } else {
    }
    return
  }
  func.func @transform_0(%arg0: i32, %arg1: i32) -> (i32, i32) {
    %c0_i32 = arith.constant 0 : i32
    return %arg0, %arg1 : i32, i32
  }
  func.func @transform_1(%arg0: i32, %arg1: i32) -> (i32, i32) {
    %c0_i32 = arith.constant 0 : i32
    %c0_i32_0 = arith.constant 0 : i32
    return %arg1, %c0_i32 : i32, i32
  }
  func.func @transform_2(%arg0: i32, %arg1: i32) -> (i32, i32) {
    %c0_i32 = arith.constant 0 : i32
    %c0_i32_0 = arith.constant 0 : i32
    %c0_i32_1 = arith.constant 0 : i32
    return %c0_i32, %c0_i32_0 : i32, i32
  }
  func.func @transform_3(%arg0: i32, %arg1: i32) -> (i32, i32) {
    %c0_i32 = arith.constant 0 : i32
    %c0_i32_0 = arith.constant 0 : i32
    return %arg0, %c0_i32 : i32, i32
  }
  func.func @transform_4(%arg0: i32, %arg1: i32) -> (i32, i32) {
    %c0_i32 = arith.constant 0 : i32
    %c0_i32_0 = arith.constant 0 : i32
    %c0_i32_1 = arith.constant 0 : i32
    return %c0_i32, %c0_i32_0 : i32, i32
  }
  func.func @transform_5(%arg0: i32, %arg1: i32) -> (i32, i32) {
    %c0_i32 = arith.constant 0 : i32
    %c0_i32_0 = arith.constant 0 : i32
    %c0_i32_1 = arith.constant 0 : i32
    return %c0_i32, %c0_i32_0 : i32, i32
  }
  func.func @transform_6(%arg0: i32, %arg1: i32) -> (i32, i32) {
    %c0_i32 = arith.constant 0 : i32
    %c0_i32_0 = arith.constant 0 : i32
    return %arg0, %c0_i32 : i32, i32
  }
}

</mosaic_0001>

<bundles_post_ra>
// kernel: bert_layer_forward.5
= control target key start
LH: loop header
LB: loop body
LE: loop exit
PB: predicated region body
PF: predicated region fallthrough
CT: control target
= control target key end

     0   :  { %s597_s12 = smov 0   ;;  %s599_s13 = smov 0   ;;  %s641_s0 = inlined_call_operand.vmem [shape: bf16[16,32], index: 0, kind: input, shape index: {}]   ;;  %s642_s1 = inlined_call_operand.vmem [shape: bf16[3,32,32], index: 1, kind: input, shape index: {}]   ;;  %s643_s2 = inlined_call_operand.vmem [shape: f32[3,1,32], index: 2, kind: input, shape index: {}]   ;;  %s644_s3 = inlined_call_operand.vmem [shape: bf16[3,16,32], index: 3, kind: output, shape index: {}]  }
   0x1   :  { %s601_s14 = smov 0  }
   0x2 LB: > { %s28_s15 = sadd.s32 1, %s569_s13  ;;  %p493_p0 = scmp.ge.s32.totalorder %s573_s14, 1  ;;  %s573_s14 = sphi %s601_s14, %s13_s14   ;;  %s569_s13 = sphi %s599_s13, %s646_s13   ;;  %s565_s12 = sphi %s597_s12, %s645_s12  }
   0x3   : > { %p30_p1 = scmp.ge.s32.totalorder %s28_s15, 3  ;;  %p189_p2 = scmp.lt.s32.totalorder %s573_s14, 4 }
   0x5   : > { %s648_s15 = smov (%p30_p1, %s28_s15), 0  ;;  %p190_p3 = pnand %p493_p0, %p189_p2 }
   0x6   : > { %p242_p4 = scmp.lt.s32.totalorder (!%p190_p3), %s565_s12, 2  ;;  %vm269_vm0 = vcmask (!%p190_p3), 261120   ;;  %v575_v0 = vmov (!%p190_p3), 0.0   ;;  %vm576_vm1 = vmmov (!%p190_p3), 0   ;;  %v550_v3 = vld [vmem:[%s641_s0] sm:$0xff] (!%p190_p3)   ;;  %vm368_vm2 = vcmask (!%p190_p3), 257024  }
   0x7   : > { %193 = sbr.rel (%p190_p3) target bundleno = 254 (0xfe), region = 32  ;;  %514 = vmatprep.subr.bf16.mxu0 (!%p190_p3), %v575_v0  ;;  %518 = vmatprep.mubr.msk.bf16.mxu0 (!%p190_p3), %vm576_vm1, %v575_v0  ;;  %270 = vst.msk [vmem:[#allocation2] sm:$0xff] (!%p190_p3), %vm269_vm0, %v575_v0  ;;  %271 = vst.msk [vmem:[#allocation2 + $0x8] sm:$0xff] (!%p190_p3), %vm269_vm0, %v575_v0 }
   0xe   : > { %s650_s12 = smov (!%p242_p4, %s565_s12), 2  ;;  %v272_v4 = vld [vmem:[#allocation2] sm:$0xff]  ;;  %v273_v6 = vld [vmem:[#allocation2 + $0x8] sm:$0xff] }
   0xf   : > { %s507_s16 = sshll.u32 %s650_s12, 4  ;;  %s253_s24 = scalar_lea.vmem %s643_s2, %s650_s12 }
  0x10   : > { %s249_s19 = scalar_lea.vmem %s642_s1, %s507_s16  ;;  %v502_v12 = vld [vmem:[%s253_s24] ss:$0 sm:$0xff]  ;;  %s508_s25 = sshll.u32 %s650_s12, 3 }
  0x11   : > { %v548_v1 = vld [vmem:[%s249_s19] sm:$0xff]   ;;  %v549_v2 = vld [vmem:[%s249_s19 + $0x8] sm:$0xff]   ;;  %s262_s28 = scalar_lea.vmem %s644_s3, %s508_s25 }
  0x12   : > { %515 = vmatpush3.bf16.msra.mxu0 %v548_v1 }
  0x13   : > { %516 = vmatprep.subr.bf16.mxu0 %v575_v0 }
  0x16   : > { %517 = vmatpush3.bf16.msra.mxu0 %v549_v2 }
  0x19   : > { %519 = vmatmul.mubr.msk.bf16.vlgmr.msra.gmra.mrb[0].mxu0 %vm269_vm0, %v550_v3 }
  0xec   : > { %v335_v5 = vpop.f32.mrb[0].mxu0 }
  0xed   : > { %v342_v7 = vadd.f32 %v335_v5, %v272_v4  ;;  %v520_v8 = vpop.f32.mrb[1].mxu0 }
  0xee   : > { %v338_v9 = vpop.f32.mrb[2].mxu0 }
  0xef   : > { %344 = vst.msk [vmem:[#allocation2] sm:$0xff] %vm269_vm0, %v342_v7  ;;  %v343_v10 = vadd.f32 %v338_v9, %v273_v6  ;;  %v521_v11 = vpop.f32.mrb[3].mxu0 }
  0xf1   : > { %345 = vst.msk [vmem:[#allocation2 + $0x8] sm:$0xff] %vm269_vm0, %v343_v10 }
  0xf6   : > { %v349_v13 = vld [vmem:[#allocation2] sm:$0xff] }
  0xf7   : > { %v358_v14 = vadd.f32 %v502_v12, %v349_v13 }
  0xf8   : > { %v350_v15 = vld [vmem:[#allocation2 + $0x8] sm:$0xff] }
  0xf9   : > { %v509_v16 = vpack.c.bf16 %v358_v14, %v358_v14  ;;  %v359_v17 = vadd.f32 %v502_v12, %v350_v15 }
  0xfb   : > { %369 = vst.msk [vmem:[%s262_s28] sm:$0xf] %vm368_vm2, %v509_v16  ;;  %v510_v18 = vpack.c.bf16 %v359_v17, %v359_v17 }
  0xfd   : > { %370 = vst.msk [vmem:[%s262_s28 + $0x4] sm:$0xf] %vm368_vm2, %v510_v18 }
  0xfe PF: > { %s13_s14 = sadd.s32 1, %s573_s14   ;;  %s645_s12 = smov %s569_s13 }
  0xff   : > { %p10_p5 = scmp.ge.s32.totalorder %s13_s14, 5   ;;  %s646_s13 = smov %s648_s15 }
 0x101   :  { %12 = sbr.rel (!%p10_p5) target bundleno = 2 (0x2), region = 76 }

// kernel: bert_layer_forward.6
= control target key start
LH: loop header
LB: loop body
LE: loop exit
PB: predicated region body
PF: predicated region fallthrough
CT: control target
= control target key end

     0   :  { %11 = vsyncpa [#allocation3], 0  ;;  %s1589_s0 = inlined_call_operand.vmem [shape: bf16[3,2,8,32], index: 0, kind: input, shape index: {}, may-alias: {0,1,2}]   ;;  %s1590_s1 = inlined_call_operand.vmem [shape: bf16[3,2,8,32], index: 1, kind: input, shape index: {}, may-alias: {0,1,2}]   ;;  %s1591_s2 = inlined_call_operand.vmem [shape: bf16[3,2,8,32], index: 2, kind: input, shape index: {}, may-alias: {0,1,2}]   ;;  %s1592_s3 = inlined_call_operand.vmem [shape: f32[2,1,8], index: 3, kind: input, shape index: {}]   ;;  %s1593_s4 = inlined_call_operand.vmem [shape: bf16[2,8,32], index: 4, kind: output, shape index: {0}]   ;;  %s1594_s5 = inlined_call_operand.hbm [shape: bf16[2,4,8,8], index: 5, kind: output, shape index: {1}]  }
   0x1   :  { %13 = vsyncpa [#allocation3 + $0x1], 0  ;;  %s1366_s18 = smov 0   ;;  %s1368_s19 = smov 0  }
   0x2   :  { %s1370_s20 = smov 0   ;;  %s1372_s21 = smov 0  }
   0x3   :  { %s1374_s22 = smov 0   ;;  %s1376_s23 = smov 0  }
   0x4 LB: > { %s1058_s24 = sadd.s32 4294967295, %s1323_s23   ;;  %s1059_s25 = sadd.s32 4294967294, %s1323_s23   ;;  %s1323_s23 = sphi %s1376_s23, %s19_s23   ;;  %s1319_s22 = sphi %s1374_s22, %s1601_s22   ;;  %s1315_s21 = sphi %s1372_s21, %s1600_s21   ;;  %s1311_s20 = sphi %s1370_s20, %s1599_s20   ;;  %s1307_s19 = sphi %s1368_s19, %s1598_s19   ;;  %s1303_s18 = sphi %s1366_s18, %s1597_s18  }
   0x5   : > { %s38_s26 = sadd.s32 1, %s1319_s22  ;;  %s191_s27 = sadd.s32 1, %s1311_s20 }
   0x6   : > { %p40_p0 = scmp.ge.s32.totalorder %s38_s26, 2  ;;  %p201_p1 = scmp.ne.s32.totalorder %s1311_s20, %s1307_s19 }
   0x7   : > { %p202_p2 = scmp.eq.s32.totalorder %s1058_s24, 1  ;;  %p207_p3 = scmp.ne.s32.totalorder %s1307_s19, %s1303_s18 }
   0x8   : > { %s1603_s26 = smov (%p40_p0, %s38_s26), 0  ;;  %p208_p5 = scmp.eq.s32.totalorder %s1059_s25, 1 }
   0x9   : > { %p1406_p4 = por %p202_p2, %p201_p1  ;;  %s184_s29 = ssub.s32 %s1319_s22, %s1603_s26 }
   0xa   : > { %p1062_p6 = scmp.ge.s32.totalorder %s1323_s23, 1  ;;  %p189_p7 = scmp.eq.s32.totalorder %s184_s29, 0 }
   0xb   : > { %p1413_p8 = por %p208_p5, %p207_p3  ;;  %p267_p9 = scmp.lt.s32.totalorder %s1323_s23, 3 }
   0xc   : > { %s1419_s6 = scalar_select %p189_p7, %s1311_s20, %s191_s27  }
   0xd   : > { %p268_p10 = pnand %p1062_p6, %p267_p9 }
   0xe   : > { %p329_p11 = scmp.lt.s32.totalorder (!%p268_p10), %s1315_s21, 1  ;;  %v1325_v0 = vmov (!%p268_p10), 0.0   ;;  %vm1326_vm0 = vmmov (!%p268_p10), 0   ;;  %vm380_vm1 = vcmask (!%p268_p10), 64512   ;;  %s1327_s24 = smov (!%p268_p10), 120   ;;  %vm444_vm2 = vcmask (!%p268_p10), 1043456  }
   0xf   : > { %271 = sbr.rel (%p268_p10) target bundleno = 1486 (0x5ce), region = 36  ;;  %1113 = vmatprep.subr.bf16.mxu0 (!%p268_p10), %v1325_v0  ;;  %1115 = vmatprep.mubr.msk.bf16.mxu0 (!%p268_p10), %vm1326_vm0, %v1325_v0  ;;  %s1328_s25 = smov (!%p268_p10), 112   ;;  %vm439_vm3 = vcmask (!%p268_p10), 60416  }
  0x10   : > { %1119 = vmatprep.subr.bf16.mxu1 (!%p268_p10), %v1325_v0  ;;  %1121 = vmatprep.mubr.msk.bf16.mxu1 (!%p268_p10), %vm1326_vm0, %v1325_v0  ;;  %s1329_s27 = smov (!%p268_p10), 104   ;;  %s326_s10 = sand.u32 (!%p268_p10), 1, %s1307_s19  }
  0x11   : > { %s1331_s16 = smov (!%p268_p10), 16  }
  0x16   : > { %s330_s7 = scalar_select %p329_p11, %s1315_s21, 1 }
  0x18   : > { %s1429_s8 = sshll.u32 %s330_s7, 2  ;;  %s357_s17 = scalar_lea.vmem %s1592_s3, %s330_s7 }
  0x19   : > { %s968_s11 = scalar_lea.vmem %s1590_s1, %s1429_s8  ;;  %s338_s14 = scalar_lea.vmem %s1589_s0, %s1429_s8  ;;  %v1447_v4 = vld [vmem:[%s357_s17] ss:$0 sm:$0xff] }
  0x1a   : > { %v1068_v1 = vld [vmem:[%s968_s11 + $0x8] sm:$0xf]  ;;  %v370_v3 = vld [vmem:[%s338_s14] sm:$0xf]  ;;  %s972_s9 = scalar_lea.vmem %s1591_s2, %s1429_s8  ;;  %s1063_s11 = sshll.u32 %s326_s10, 4 }
  0x1b   : > { %v385_v2 = vsel %vm380_vm1, %v1068_v1, 0  ;;  %v1074_v11 = vcombine.low %v1068_v1, %v1068_v1  ;;  %v1073_v12 = vcombine.low %v370_v3, %v370_v3  ;;  %v1461_v18 = vld [vmem:[%s972_s9 + $0x10] sm:$0xf]  ;;  %s1472_s12 = scalar_lea.vmem [#allocation2], %s1063_s11  ;;  %s1493_s15 = scalar_lea.vmem %s1593_s4, %s1429_s8 }
  0x1c   : > { %1114 = vmatpush3.bf16.xpose.msra.mxu0 %v385_v2  ;;  %v446_v19 = vsel %vm444_vm2, %v1461_v18, 0  ;;  %s1330_s8 = smov 8   ;;  %s1096_s17 = sshll.u32 %s1315_s21, 8 }
  0x1d   : > { %1131 = vmatprep.subr.bf16.mxu0 %v1325_v0  ;;  %498 = vrot.lane.b32.xlu1 %v1074_v11, %s1327_s24  ;;  %s1534_s29 = scalar_lea.hbm %s1594_s5, %s1096_s17  ;;  %s1540_s7 = scalar_lea.sflag [#allocation3], %s326_s10 }
  0x1e   : > { %1120 = vmatpush3.bf16.msra.mxu1 %v446_v19  ;;  %s1332_s21 = smov [#allocation2]  }
  0x1f   : > { %1125 = vmatprep.subr.bf16.mxu1 %v1325_v0  ;;  %s1249_s11 = sshll.u32 %s1332_s21, 4  ;;  %s1250_s11 = int_to_ptr.vmem [resolvable:$false] %s1249_s11 }
  0x21   : > { %493 = vrot.lane.b32.xlu1 %v1073_v12, %s1327_s24 }
  0x23   : > { %1116 = vmatmul.mubr.msk.bf16.vlgmr.msra.gmra.mrb[0].mxu0 %vm380_vm1, %v370_v3  ;;  %v1077_v3 = vcombine.low %v1461_v18, %v1461_v18 }
  0x24   : > { %1133 = vmatprep.mubr.msk.bf16.mxu0 %vm1326_vm0, %v1325_v0 }
  0x25   : > { %620 = vrot.lane.b32.xlu1 %v1073_v12, %s1328_s25 }
  0x29   : > { %743 = vrot.lane.b32.xlu1 %v1074_v11, %s1329_s27 }
  0x2d   : > { %741 = vrot.lane.b32.xlu1 %v1073_v12, %s1329_s27 }
  0x8f   : > { %v499_v22 = vpop.permute.xlu1 %498 }
  0x90   : > { %v504_v24 = vsel %vm380_vm1, %v499_v22, 0 }
  0x93   : > { %v494_v26 = vpop.permute.xlu1 %493 }
  0x97   : > { %v621_v28 = vpop.permute.xlu1 %620 }
  0x9b   : > { %v744_v30 = vpop.permute.xlu1 %743 }
  0x9c   : > { %v749_v31 = vsel %vm380_vm1, %v744_v30, 0 }
  0x9f   : > { %v742_v32 = vpop.permute.xlu1 %741 }
  0xf6   : > { %v421_v5 = vpop.f32.mrb[0].mxu0 }
  0xf7   : > { %v422_v6 = vadd.f32 %v1447_v4, %v421_v5  ;;  %v1117_v7 = vpop.f32.mrb[1].mxu0 }
  0xf8   : > { %v424_v8 = vpop.f32.mrb[2].mxu0 }
  0xf9   : > { %v1118_v9 = vpop.f32.mrb[3].mxu0  ;;  %v427_v10 = vsel %vm380_vm1, %v422_v6, -inf }
  0xfa   : > { %428 = vmax.xlane.f32.xlu0 %v427_v10 }
 0x187   : > { %v429_v13 = vpop.xlane.xlu0 %428 }
 0x188   : > { %v430_v14 = vsub.f32 %v422_v6, %v429_v13 }
 0x18a   : > { %v431_v15 = vmul.f32 1.442695, %v430_v14 }
 0x18c   : > { %1229 = vpow2.f32 %v431_v15 }
 0x196   : > { %v1230_v16 = vpop.eup %1229 }
 0x197   : > { %v433_v17 = vsel %vm380_vm1, %v1230_v16, 0.0 }
 0x198   : > { %434 = vadd.xlane.f32.xlu0 %v433_v17 }
 0x1ae   : > { %622 = vrot.lane.b32.xlu0 %v1074_v11, %s1328_s25 }
 0x225   : > { %v435_v20 = vpop.xlane.xlu0 %434 }
 0x226   : > { %1231 = vrcp.f32 %v435_v20 }
 0x229   : > { %v623_v27 = vpop.permute.xlu0 %622 }
 0x22a   : > { %v628_v29 = vsel %vm380_vm1, %v623_v27, 0 }
 0x230   : > { %v1232_v21 = vpop.eup %1231 }
 0x231   : > { %v437_v23 = vmul.f32 %v1232_v21, %v1230_v16 }
 0x233   : > { %v438_v25 = vpack.c.bf16 %v437_v23, %v437_v23 }
 0x235   : > { %1122 = vmatmul.mubr.msk.bf16.vlgmr.msra.gmra.mrb[0].mxu1 %vm380_vm1, %v438_v25  ;;  %440 = vst.msk [vmem:[%s1472_s12] sm:$0xf] %vm439_vm3, %v438_v25 }
 0x236   : > { %1126 = vmatpush3.bf16.xpose.msra.mxu1 %v504_v24  ;;  %1127 = vmatprep.mubr.msk.bf16.mxu1 %vm1326_vm0, %v1325_v0 }
 0x237   : > { %1137 = vmatprep.subr.bf16.mxu1 %v1325_v0 }
 0x23d   : > { %1128 = vmatmul.mubr.msk.bf16.vlgmr.msra.gmra.mrb[4].mxu1 %vm380_vm1, %v494_v26 }
 0x23e   : > { %1138 = vmatpush3.bf16.xpose.msra.mxu1 %v628_v29  ;;  %1139 = vmatprep.mubr.msk.bf16.mxu1 %vm1326_vm0, %v1325_v0 }
 0x23f   : > { %1149 = vmatprep.subr.bf16.mxu1 %v1325_v0 }
 0x245   : > { %1140 = vmatmul.mubr.msk.bf16.vlgmr.msra.gmra.mrb[8].mxu1 %vm380_vm1, %v621_v28 }
 0x246   : > { %1150 = vmatpush3.bf16.xpose.msra.mxu1 %v749_v31  ;;  %1151 = vmatprep.mubr.msk.bf16.mxu1 %vm1326_vm0, %v1325_v0 }
 0x24d   : > { %1152 = vmatmul.mubr.msk.bf16.vlgmr.msra.gmra.mrb[12].mxu1 %vm380_vm1, %v742_v32 }
 0x308   : > { %v482_v33 = vpop.f32.mrb[0].mxu1 }
 0x309   : > { %v488_v34 = vpack.c.bf16 %v482_v33, %v482_v33  ;;  %v1123_v35 = vpop.f32.mrb[1].mxu1 }
 0x30a   : > { %v485_v36 = vpop.f32.mrb[2].mxu1 }
 0x30b   : > { %489 = vst.msk [vmem:[%s1493_s15] sm:$0xf] %vm439_vm3, %v488_v34  ;;  %v1124_v37 = vpop.f32.mrb[3].mxu1 }
 0x310   : > { %v540_v38 = vpop.f32.mrb[4].mxu1 }
 0x311   : > { %v541_v39 = vadd.f32 %v1447_v4, %v540_v38  ;;  %v1129_v40 = vpop.f32.mrb[5].mxu1 }
 0x312   : > { %v543_v41 = vpop.f32.mrb[6].mxu1 }
 0x313   : > { %v1130_v42 = vpop.f32.mrb[7].mxu1  ;;  %v546_v43 = vsel %vm380_vm1, %v541_v39, -inf }
 0x314   : > { %547 = vmax.xlane.f32.xlu1 %v546_v43 }
 0x318   : > { %v664_v44 = vpop.f32.mrb[8].mxu1 }
 0x319   : > { %v665_v45 = vadd.f32 %v1447_v4, %v664_v44  ;;  %v1141_v46 = vpop.f32.mrb[9].mxu1 }
 0x31a   : > { %v667_v47 = vpop.f32.mrb[10].mxu1 }
 0x31b   : > { %v670_v48 = vsel %vm380_vm1, %v665_v45, -inf  ;;  %v1142_v49 = vpop.f32.mrb[11].mxu1 }
 0x31c   : > { %671 = vmax.xlane.f32.xlu0 %v670_v48 }
 0x320   : > { %v785_v50 = vpop.f32.mrb[12].mxu1 }
 0x321   : > { %v786_v51 = vadd.f32 %v1447_v4, %v785_v50  ;;  %v1153_v52 = vpop.f32.mrb[13].mxu1 }
 0x322   : > { %v788_v53 = vpop.f32.mrb[14].mxu1 }
 0x323   : > { %v791_v54 = vsel %vm380_vm1, %v786_v51, -inf  ;;  %v1154_v55 = vpop.f32.mrb[15].mxu1 }
 0x324   : > { %792 = vmax.xlane.f32.xlu1 %v791_v54 }
 0x3a1   : > { %v548_v56 = vpop.xlane.xlu1 %547 }
 0x3a2   : > { %v549_v57 = vsub.f32 %v541_v39, %v548_v56 }
 0x3a4   : > { %v550_v58 = vmul.f32 1.442695, %v549_v57 }
 0x3a6   : > { %1233 = vpow2.f32 %v550_v58 }
 0x3a9   : > { %v672_v59 = vpop.xlane.xlu0 %671 }
 0x3aa   : > { %v673_v60 = vsub.f32 %v665_v45, %v672_v59 }
 0x3ac   : > { %v674_v61 = vmul.f32 1.442695, %v673_v60 }
 0x3ae   : > { %1235 = vpow2.f32 %v674_v61 }
 0x3b0   : > { %v1234_v62 = vpop.eup %1233 }
 0x3b1   : > { %v552_v63 = vsel %vm380_vm1, %v1234_v62, 0.0  ;;  %v793_v4 = vpop.xlane.xlu1 %792 }
 0x3b2   : > { %553 = vadd.xlane.f32.xlu1 %v552_v63  ;;  %v794_v5 = vsub.f32 %v786_v51, %v793_v4 }
 0x3b4   : > { %v795_v6 = vmul.f32 1.442695, %v794_v5 }
 0x3b6   : > { %1237 = vpow2.f32 %v795_v6 }
 0x3b8   : > { %v1236_v1 = vpop.eup %1235 }
 0x3b9   : > { %v676_v2 = vsel %vm380_vm1, %v1236_v1, 0.0 }
 0x3ba   : > { %677 = vadd.xlane.f32.xlu0 %v676_v2 }
 0x3c0   : > { %v1238_v7 = vpop.eup %1237 }
 0x3c1   : > { %v797_v8 = vsel %vm380_vm1, %v1238_v7, 0.0 }
 0x3c3   : > { %684 = vrot.lane.b32.xlu1 %v1077_v3, %s1328_s25 }
 0x3d0   : > { %563 = vrot.lane.b32.xlu0 %v1077_v3, %s1327_s24  ;;  %s892_s24 = sshll.u32 %s1472_s12, 4  ;;  %s1536_s24 = int_to_ptr.vmem [resolvable:$true] %s892_s24 }
 0x3d1   : > { %s1245_s9 = scalar_lea.vmem %s1536_s24, 256  ;;  %p1252_p1 = scmp.lt.s32.totalorder %s1536_s24, %s1250_s11 }
 0x3d2   : > { %p1246_p12 = scmp.ne.s32.totalorder %s1536_s24, %s1245_s9 }
 0x3d4   : > { %p1247_p13 = pnand %p1246_p12, %p1406_p4 }
 0x3d6   : > { %p1248_p0 = pneg %p1247_p13 }
 0x3e7   : > { %798 = vadd.xlane.f32.xlu1 %v797_v8 }
 0x3f8   : > { %805 = vrot.lane.b32.xlu1 %v1077_v3, %s1329_s27 }
 0x43f   : > { %v554_v9 = vpop.xlane.xlu1 %553 }
 0x440   : > { %1239 = vrcp.f32 %v554_v9 }
 0x443   : > { %v685_v15 = vpop.permute.xlu1 %684 }
 0x444   : > { %v690_v17 = vsel %vm444_vm2, %v685_v15, 0 }
 0x447   : > { %v678_v10 = vpop.xlane.xlu0 %677 }
 0x448   : > { %1241 = vrcp.f32 %v678_v10 }
 0x44a   : > { %v1240_v11 = vpop.eup %1239 }
 0x44b   : > { %v556_v12 = vmul.f32 %v1240_v11, %v1234_v62  ;;  %v564_v13 = vpop.permute.xlu0 %563 }
 0x44c   : > { %v569_v14 = vsel %vm444_vm2, %v564_v13, 0 }
 0x44d   : > { %1132 = vmatpush3.bf16.msra.mxu0 %v569_v14  ;;  %v557_v16 = vpack.c.bf16 %v556_v12, %v556_v12 }
 0x44e   : > { %1143 = vmatprep.subr.bf16.mxu0 %v1325_v0 }
 0x44f   : > { %1076 = vst.msk [vmem:[%s1472_s12 + $0x4] sm:$0xf] %vm439_vm3, %v557_v16 }
 0x450   : > { %1134 = vmatmul.mubr.msk.bf16.vlgmr.msra.gmra.mrb[4].mxu0 %vm380_vm1, %v557_v16 }
 0x451   : > { %1144 = vmatpush3.bf16.msra.mxu0 %v690_v17  ;;  %1145 = vmatprep.mubr.msk.bf16.mxu0 %vm1326_vm0, %v1325_v0 }
 0x452   : > { %v1242_v18 = vpop.eup %1241  ;;  %1155 = vmatprep.subr.bf16.mxu0 %v1325_v0 }
 0x453   : > { %v680_v19 = vmul.f32 %v1242_v18, %v1236_v1 }
 0x455   : > { %v681_v20 = vpack.c.bf16 %v680_v19, %v680_v19 }
 0x457   : > { %1081 = vst.msk [vmem:[%s1472_s12 + $0x8] sm:$0xf] %vm439_vm3, %v681_v20 }
 0x458   : > { %1146 = vmatmul.mubr.msk.bf16.vlgmr.msra.gmra.mrb[8].mxu0 %vm380_vm1, %v681_v20 }
 0x459   : > { %1157 = vmatprep.mubr.msk.bf16.mxu0 %vm1326_vm0, %v1325_v0 }
 0x474   : > { %v799_v21 = vpop.xlane.xlu1 %798 }
 0x475   : > { %1243 = vrcp.f32 %v799_v21 }
 0x478   : > { %v806_v22 = vpop.permute.xlu1 %805 }
 0x479   : > { %v811_v23 = vsel %vm444_vm2, %v806_v22, 0 }
 0x47a   : > { %1156 = vmatpush3.bf16.msra.mxu0 %v811_v23 }
 0x47f   : > { %v1244_v24 = vpop.eup %1243 }
 0x480   : > { %v801_v25 = vmul.f32 %v1244_v24, %v1238_v7 }
 0x482   : > { %v802_v26 = vpack.c.bf16 %v801_v25, %v801_v25 }
 0x484   : > { %1085 = vst.msk [vmem:[%s1472_s12 + $0xc] sm:$0xf] %vm439_vm3, %v802_v26  ;;  %1158 = vmatmul.mubr.msk.bf16.vlgmr.msra.gmra.mrb[12].mxu0 %vm380_vm1, %v802_v26  ;;  %s1251_s12 = scalar_lea.vmem %s1250_s11, 512 }
 0x485   : > { %p1253_p2 = scmp.lt.s32.totalorder %s1251_s12, %s1245_s9 }
 0x487   : > { %p1254_p3 = por %p1253_p2, %p1252_p1 }
 0x489   : > { %p1255_p5 = pnand %p1254_p3, %p1248_p0 }
 0x523   : > { %v605_v27 = vpop.f32.mrb[4].mxu0 }
 0x524   : > { %v1093_v28 = vpack.c.bf16 %v605_v27, %v605_v27  ;;  %v1135_v29 = vpop.f32.mrb[5].mxu0 }
 0x525   : > { %v608_v0 = vpop.f32.mrb[6].mxu0 }
 0x526   : > { %615 = vrot.lane.b32.xlu0 %v1093_v28, %s1330_s8  ;;  %v1136_v30 = vpop.f32.mrb[7].mxu0 }
 0x52b   : > { %v726_v31 = vpop.f32.mrb[8].mxu0 }
 0x52c   : > { %v1094_v32 = vpack.c.bf16 %v726_v31, %v726_v31  ;;  %v1147_v33 = vpop.f32.mrb[9].mxu0 }
 0x52d   : > { %v729_v34 = vpop.f32.mrb[10].mxu0 }
 0x52e   : > { %736 = vrot.lane.b32.xlu1 %v1094_v32, %s1331_s16  ;;  %v1148_v35 = vpop.f32.mrb[11].mxu0 }
 0x52f   : > { %1258 = shalt.err (!%p1255_p5)
}
 0x530   : > { %s1259_s10 = scalar_lea.hbm %s1534_s29, 256  ;;  %s1263_s8 = scalar_lea.hbm %s1594_s5, 512 }
 0x531   : > { %p1260_p6 = scmp.ne.s32.totalorder %s1534_s29, %s1259_s10  ;;  %p1264_p10 = scmp.lt.u32.totalorder %s1534_s29, %s1594_s5 }
 0x532   : > { %p1265_p11 = scmp.lt.u32.totalorder %s1263_s8, %s1259_s10  ;;  %p1267_p13 = scmp.lt.u32.totalorder %s1259_s10, %s1534_s29 }
 0x533   : > { %p1261_p7 = pnand %p1260_p6, %p1406_p4 }
 0x534   : > { %p1266_p12 = por %p1265_p11, %p1264_p10 }
 0x535   : > { %p1262_p9 = pneg %p1261_p7 }
 0x536   : > { %p1268_p0 = por %p1267_p13, %p1266_p12 }
 0x538   : > { %p1269_p1 = pnand %p1268_p0, %p1262_p9 }
 0x53a   : > { %1272 = shalt.err (!%p1269_p1)
}
 0x53b   : > { %s1333_s25 = smov 64   ;;  %s1334_s27 = smov 4   ;;  %vm618_vm4 = vcmask 126016   ;;  %vm739_vm5 = vcmask 191616   ;;  %vm860_vm6 = vcmask 257216  }
 0x53c   : > { %1161 = dma.vmem_to_hbm [thread:$0]  (%p1406_p4), %s1536_s24, 256, %s1534_s29, %s1540_s7, %s1333_s25, %s1333_s25, %s1334_s27  }
 0x53d   : > { %s1335_s9 = smov 24  }
 0x557   : > { %v847_v36 = vpop.f32.mrb[12].mxu0 }
 0x558   : > { %v1095_v37 = vpack.c.bf16 %v847_v36, %v847_v36  ;;  %v1159_v38 = vpop.f32.mrb[13].mxu0 }
 0x559   : > { %v850_v39 = vpop.f32.mrb[14].mxu0 }
 0x55a   : > { %857 = vrot.lane.b32.xlu0 %v1095_v37, %s1335_s9  ;;  %v1160_v40 = vpop.f32.mrb[15].mxu0 }
 0x598   : > { %v616_v41 = vpop.permute.xlu0 %615 }
 0x599   : > { %619 = vst.msk [vmem:[%s1493_s15] sm:$0xf] %vm618_vm4, %v616_v41 }
 0x5a0   : > { %v737_v42 = vpop.permute.xlu1 %736 }
 0x5a1   : > { %740 = vst.msk [vmem:[%s1493_s15] sm:$0xf] %vm739_vm5, %v737_v42 }
 0x5cc   : > { %v858_v43 = vpop.permute.xlu0 %857 }
 0x5cd   : > { %861 = vst.msk [vmem:[%s1493_s15] sm:$0xf] %vm860_vm6, %v858_v43 }
 0x5ce PF: > { %p1167_p4 = scmp.ge.s32.totalorder %s1323_s23, 2  ;;  %s920_s28 = sand.u32 1, %s1303_s18  }
 0x5cf   : > { %s921_s24 = scalar_lea.sflag [#allocation3], %s920_s28 }
 0x5d0   : > { %p1164_p2 = pnand %p1167_p4, %p1413_p8 }
 0x5d2   : > { %1298 = dma.done.wait (!%p1164_p2), %s921_s24, 256  }
 0x5d3   : > { %1300 = vsyncadd (!%p1164_p2), %s921_s24, 4294967040  ;;  %s19_s23 = sadd.s32 1, %s1323_s23   ;;  %s1597_s18 = smov %s1307_s19 }
 0x5d4   : > { %p16_p3 = scmp.ge.s32.totalorder %s19_s23, 4   ;;  %s1598_s19 = smov %s1311_s20 }
 0x5d5   : > { %s1599_s20 = smov %s1419_s6  ;;  %s1600_s21 = smov %s1319_s22 }
 0x5d6   : > { %s1601_s22 = smov %s1603_s26  ;;  %18 = sbr.rel (!%p16_p3) target bundleno = 4 (0x4), region = 95 }
 0x5dd   :  { %926 = vsyncpa [#allocation3], 1 }
 0x5de   :  { %928 = vsyncpa [#allocation3 + $0x1], 1 }

// kernel: bert_layer_forward.7
= control target key start
LH: loop header
LB: loop body
LE: loop exit
PB: predicated region body
PF: predicated region fallthrough
CT: control target
= control target key end

     0   :  { %vm28_vm0 = vcmask 261120   ;;  %v220_v0 = vmov 0.0   ;;  %vm221_vm1 = vmmov 0   ;;  %vm178_vm2 = vcmask 257024   ;;  %s293_s1 = inlined_call_operand.vmem [shape: bf16[32,32], index: 1, kind: input, shape index: {}]   ;;  %s294_s0 = inlined_call_operand.vmem [shape: bf16[16,32], index: 0, kind: input, shape index: {}]   ;;  %s295_s3 = inlined_call_operand.vmem [shape: bf16[16,32], index: 3, kind: input, shape index: {}]   ;;  %s296_s2 = inlined_call_operand.vmem [shape: f32[1,32], index: 2, kind: input, shape index: {}]   ;;  %s297_s4 = inlined_call_operand.vmem [shape: f32[1,32], index: 4, kind: input, shape index: {}]   ;;  %s298_s5 = inlined_call_operand.vmem [shape: f32[1,32], index: 5, kind: input, shape index: {}]   ;;  %s299_s6 = inlined_call_operand.vmem [shape: bf16[16,32], index: 6, kind: output, shape index: {}]  }
   0x1   :  { %203 = vmatprep.subr.bf16.mxu0 %v220_v0  ;;  %v213_v1 = vld [vmem:[%s293_s1] sm:$0xff]   ;;  %207 = vmatprep.mubr.msk.bf16.mxu0 %vm221_vm1, %v220_v0  ;;  %29 = vst.msk [vmem:[#allocation2] sm:$0xff] %vm28_vm0, %v220_v0  ;;  %30 = vst.msk [vmem:[#allocation2 + $0x8] sm:$0xff] %vm28_vm0, %v220_v0  ;;  %v214_v2 = vld [vmem:[%s293_s1 + $0x8] sm:$0xff]  }
   0x2   :  { %204 = vmatpush3.bf16.msra.mxu0 %v213_v1  ;;  %v215_v3 = vld [vmem:[%s294_s0] sm:$0xff]  }
   0x3   :  { %205 = vmatprep.subr.bf16.mxu0 %v220_v0  ;;  %v197_v12 = vld [vmem:[%s295_s3] sm:$0xff]  }
   0x4   :  { %v189_v13 = vld [vmem:[%s296_s2] ss:$0 sm:$0xff]  ;;  %v198_v14 = vunpack.c.l.bf16 %v197_v12  ;;  %v199_v17 = vunpack.c.h.bf16 %v197_v12 }
   0x5   :  { %v190_v41 = vld [vmem:[%s297_s4] ss:$0 sm:$0xff] }
   0x6   :  { %206 = vmatpush3.bf16.msra.mxu0 %v214_v2  ;;  %v191_v43 = vld [vmem:[%s298_s5] ss:$0 sm:$0xff] }
   0x8   :  { %v31_v4 = vld [vmem:[#allocation2] sm:$0xff]  ;;  %v32_v6 = vld [vmem:[#allocation2 + $0x8] sm:$0xff] }
   0x9   :  { %208 = vmatmul.mubr.msk.bf16.vlgmr.msra.gmra.mrb[0].mxu0 %vm28_vm0, %v215_v3 }
  0xdc   :  { %v94_v5 = vpop.f32.mrb[0].mxu0 }
  0xdd   :  { %v101_v7 = vadd.f32 %v94_v5, %v31_v4  ;;  %v209_v8 = vpop.f32.mrb[1].mxu0 }
  0xde   :  { %v97_v9 = vpop.f32.mrb[2].mxu0 }
  0xdf   :  { %103 = vst.msk [vmem:[#allocation2] sm:$0xff] %vm28_vm0, %v101_v7  ;;  %v102_v10 = vadd.f32 %v97_v9, %v32_v6  ;;  %v210_v11 = vpop.f32.mrb[3].mxu0 }
  0xe1   :  { %104 = vst.msk [vmem:[#allocation2 + $0x8] sm:$0xff] %vm28_vm0, %v102_v10 }
  0xe6   :  { %v108_v15 = vld [vmem:[#allocation2] sm:$0xff] }
  0xe7   :  { %v117_v16 = vadd.f32 %v189_v13, %v108_v15 }
  0xe8   :  { %v109_v18 = vld [vmem:[#allocation2 + $0x8] sm:$0xff] }
  0xe9   :  { %v123_v19 = vadd.f32 %v198_v14, %v117_v16  ;;  %v118_v20 = vadd.f32 %v189_v13, %v109_v18 }
  0xeb   :  { %v125_v21 = vsel %vm28_vm0, %v123_v19, 0.0  ;;  %v124_v22 = vadd.f32 %v199_v17, %v118_v20 }
  0xec   :  { %126 = vadd.xlane.f32.xlu0 %v125_v21 }
  0xed   :  { %v128_v23 = vsel %vm28_vm0, %v124_v22, 0.0 }
  0xf0   :  { %129 = vadd.xlane.f32.xlu0 %v128_v23 }
 0x179   :  { %v127_v24 = vpop.xlane.xlu0 %126 }
 0x17a   :  { %v132_v25 = vmul.f32 0.03125, %v127_v24 }
 0x17c   :  { %v134_v26 = vsub.f32 %v123_v19, %v132_v25 }
 0x17d   :  { %v130_v27 = vpop.xlane.xlu0 %129 }
 0x17e   :  { %v133_v28 = vmul.f32 0.03125, %v130_v27  ;;  %v136_v29 = vmul.f32 %v134_v26, %v134_v26 }
 0x180   :  { %v135_v30 = vsub.f32 %v124_v22, %v133_v28  ;;  %v138_v31 = vsel %vm28_vm0, %v136_v29, 0.0 }
 0x181   :  { %139 = vadd.xlane.f32.xlu1 %v138_v31 }
 0x182   :  { %v137_v32 = vmul.f32 %v135_v30, %v135_v30 }
 0x184   :  { %v141_v33 = vsel %vm28_vm0, %v137_v32, 0.0 }
 0x185   :  { %142 = vadd.xlane.f32.xlu1 %v141_v33 }
 0x20e   :  { %v140_v34 = vpop.xlane.xlu1 %139 }
 0x20f   :  { %v144_v35 = vmul.f32 0.03125, %v140_v34 }
 0x211   :  { %v146_v36 = vadd.f32 1e-05, %v144_v35 }
 0x212   :  { %v143_v37 = vpop.xlane.xlu1 %142 }
 0x213   :  { %216 = vrsqrt.f32 %v146_v36  ;;  %v145_v38 = vmul.f32 0.03125, %v143_v37 }
 0x215   :  { %v147_v39 = vadd.f32 1e-05, %v145_v38 }
 0x217   :  { %218 = vrsqrt.f32 %v147_v39 }
 0x21d   :  { %v217_v40 = vpop.eup %216 }
 0x21e   :  { %v150_v42 = vmul.f32 %v217_v40, %v134_v26 }
 0x220   :  { %v159_v44 = vmul.f32 %v190_v41, %v150_v42 }
 0x221   :  { %v219_v45 = vpop.eup %218 }
 0x222   :  { %v168_v46 = vadd.f32 %v191_v43, %v159_v44  ;;  %v151_v47 = vmul.f32 %v219_v45, %v135_v30 }
 0x224   :  { %v194_v48 = vpack.c.bf16 %v168_v46, %v168_v46  ;;  %v160_v49 = vmul.f32 %v190_v41, %v151_v47 }
 0x226   :  { %179 = vst.msk [vmem:[%s299_s6] sm:$0xf] %vm178_vm2, %v194_v48  ;;  %v169_v50 = vadd.f32 %v191_v43, %v160_v49 }
 0x228   :  { %v195_v51 = vpack.c.bf16 %v169_v50, %v169_v50 }
 0x22a   :  { %180 = vst.msk [vmem:[%s299_s6 + $0x4] sm:$0xf] %vm178_vm2, %v195_v51 }

// kernel: bert_layer_forward.8
= control target key start
LH: loop header
LB: loop body
LE: loop exit
PB: predicated region body
PF: predicated region fallthrough
CT: control target
= control target key end

     0   :  { %vm19_vm0 = vcmask 523264   ;;  %v153_v0 = vmov 0.0   ;;  %vm154_vm1 = vmmov 0   ;;  %vm47_vm2 = vcmask 261120   ;;  %s197_s1 = inlined_call_operand.vmem [shape: bf16[32,64], index: 1, kind: input, shape index: {}]   ;;  %s198_s0 = inlined_call_operand.vmem [shape: bf16[16,32], index: 0, kind: input, shape index: {}]   ;;  %s199_s2 = inlined_call_operand.vmem [shape: f32[1,64], index: 2, kind: input, shape index: {}]   ;;  %s200_s3 = inlined_call_operand.vmem [shape: bf16[16,64], index: 3, kind: output, shape index: {}]  }
   0x1   :  { %140 = vmatprep.subr.bf16.mxu0 %v153_v0  ;;  %v150_v1 = vld [vmem:[%s197_s1] sm:$0xff]   ;;  %144 = vmatprep.mubr.msk.bf16.mxu0 %vm154_vm1, %v153_v0  ;;  %20 = vst.msk [vmem:[#allocation2] sm:$0xff] %vm19_vm0, %v153_v0  ;;  %21 = vst.msk [vmem:[#allocation2 + $0x8] sm:$0xff] %vm19_vm0, %v153_v0  ;;  %v151_v2 = vld [vmem:[%s197_s1 + $0x8] sm:$0xff]   ;;  %vm121_vm3 = vcmask 519168  }
   0x2   :  { %141 = vmatpush3.bf16.msra.mxu0 %v150_v1  ;;  %v152_v3 = vld [vmem:[%s198_s0] sm:$0xff]  }
   0x3   :  { %142 = vmatprep.subr.bf16.mxu0 %v153_v0  ;;  %v132_v12 = vld [vmem:[%s199_s2] ss:$0 sm:$0xff] }
   0x6   :  { %143 = vmatpush3.bf16.msra.mxu0 %v151_v2 }
   0x8   :  { %v22_v4 = vld [vmem:[#allocation2] sm:$0xff]  ;;  %v23_v6 = vld [vmem:[#allocation2 + $0x8] sm:$0xff] }
   0x9   :  { %145 = vmatmul.mubr.msk.bf16.vlgmr.msra.gmra.mrb[0].mxu0 %vm47_vm2, %v152_v3 }
  0xdc   :  { %v85_v5 = vpop.f32.mrb[0].mxu0 }
  0xdd   :  { %v92_v7 = vadd.f32 %v85_v5, %v22_v4  ;;  %v146_v8 = vpop.f32.mrb[1].mxu0 }
  0xde   :  { %v88_v9 = vpop.f32.mrb[2].mxu0 }
  0xdf   :  { %95 = vst.msk [vmem:[#allocation2] sm:$0xff] %vm19_vm0, %v92_v7  ;;  %v93_v10 = vadd.f32 %v88_v9, %v23_v6  ;;  %v147_v11 = vpop.f32.mrb[3].mxu0 }
  0xe1   :  { %96 = vst.msk [vmem:[#allocation2 + $0x8] sm:$0xff] %vm19_vm0, %v93_v10 }
  0xe6   :  { %v100_v13 = vld [vmem:[#allocation2] sm:$0xff] }
  0xe7   :  { %v109_v14 = vadd.f32 %v132_v12, %v100_v13 }
  0xe8   :  { %v101_v15 = vld [vmem:[#allocation2 + $0x8] sm:$0xff] }
  0xe9   :  { %v111_v16 = vmax.f32 %v109_v14, 0.0  ;;  %v110_v17 = vadd.f32 %v132_v12, %v101_v15 }
  0xeb   :  { %v135_v18 = vpack.c.bf16 %v111_v16, %v111_v16  ;;  %v112_v19 = vmax.f32 %v110_v17, 0.0 }
  0xed   :  { %122 = vst.msk [vmem:[%s200_s3] sm:$0xf] %vm121_vm3, %v135_v18  ;;  %v136_v20 = vpack.c.bf16 %v112_v19, %v112_v19 }
  0xef   :  { %123 = vst.msk [vmem:[%s200_s3 + $0x4] sm:$0xf] %vm121_vm3, %v136_v20 }

// kernel: bert_layer_forward.9
= control target key start
LH: loop header
LB: loop body
LE: loop exit
PB: predicated region body
PF: predicated region fallthrough
CT: control target
= control target key end

     0   :  { %v274_v1 = vmov 0.0   ;;  %vm275_vm0 = vmmov 0   ;;  %vm29_vm1 = vcmask 261120   ;;  %s363_s0 = inlined_call_operand.vmem [shape: bf16[16,64], index: 0, kind: input, shape index: {}]   ;;  %s364_s1 = inlined_call_operand.vmem [shape: bf16[64,32], index: 1, kind: input, shape index: {}]   ;;  %s365_s2 = inlined_call_operand.vmem [shape: f32[1,32], index: 2, kind: input, shape index: {}]   ;;  %s366_s3 = inlined_call_operand.vmem [shape: bf16[16,32], index: 3, kind: input, shape index: {}]   ;;  %s367_s4 = inlined_call_operand.vmem [shape: f32[1,32], index: 4, kind: input, shape index: {}]   ;;  %s368_s5 = inlined_call_operand.vmem [shape: f32[1,32], index: 5, kind: input, shape index: {}]   ;;  %s369_s6 = inlined_call_operand.hbm [shape: f32[16,32], index: 6, kind: output, shape index: {}]  }
   0x1   :  { %v241_v0 = vld [vmem:[%s364_s1] sm:$0xff]   ;;  %224 = vmatprep.subr.bf16.mxu0 %v274_v1  ;;  %v242_v2 = vld [vmem:[%s364_s1 + $0x8] sm:$0xff]   ;;  %232 = vmatprep.mubr.msk.bf16.mxu0 %vm275_vm0, %v274_v1  ;;  %30 = vst.msk [vmem:[#allocation2] sm:$0xff] %vm29_vm1, %v274_v1  ;;  %31 = vst.msk [vmem:[#allocation2 + $0x8] sm:$0xff] %vm29_vm1, %v274_v1 }
   0x2   :  { %225 = vmatpush3.bf16.msra.mxu0 %v241_v0 }
   0x3   :  { %226 = vmatprep.subr.bf16.mxu0 %v274_v1 }
   0x4   :  { %11 = vsyncpa [#allocation4], 0  ;;  %v243_v3 = vld [vmem:[%s364_s1 + $0x10] sm:$0xff]   ;;  %v244_v4 = vld [vmem:[%s364_s1 + $0x18] sm:$0xff]   ;;  %vm73_vm2 = vcmask 523264   ;;  %s276_s11 = smov [#allocation3]  }
   0x5   :  { %v245_v5 = vld [vmem:[%s363_s0] sm:$0xff]   ;;  %s195_s12 = sshll.u32 %s276_s11, 4  ;;  %s196_s12 = int_to_ptr.vmem [resolvable:$true] %s195_s12 }
   0x6   :  { %227 = vmatpush3.bf16.msra.mxu0 %v242_v2  ;;  %v216_v14 = vld [vmem:[%s366_s3] sm:$0xff]   ;;  %s250_s13 = scalar_lea.vmem %s196_s12, 256  ;;  %p255_p1 = scmp.lt.s32.totalorder %s196_s12, %s196_s12 }
   0x7   :  { %228 = vmatprep.subr.bf16.mxu0 %v274_v1  ;;  %v212_v15 = vld [vmem:[%s365_s2] ss:$0 sm:$0xff]  ;;  %v217_v16 = vunpack.c.l.bf16 %v216_v14  ;;  %v218_v19 = vunpack.c.h.bf16 %v216_v14  ;;  %p251_p0 = scmp.ne.s32.totalorder %s196_s12, %s250_s13  ;;  %p256_p2 = scmp.lt.s32.totalorder %s250_s13, %s250_s13 }
   0x8   :  { %v32_v6 = vld [vmem:[#allocation2] sm:$0xff]  ;;  %v33_v8 = vld [vmem:[#allocation2 + $0x8] sm:$0xff] }
   0x9   :  { %v213_v43 = vld [vmem:[%s367_s4] ss:$0 sm:$0xff]  ;;  %p257_p3 = por %p256_p2, %p255_p1 }
   0xa   :  { %229 = vmatpush3.bf16.msra.mxu0 %v243_v3  ;;  %v214_v45 = vld [vmem:[%s368_s5] ss:$0 sm:$0xff] }
   0xb   :  { %230 = vmatprep.subr.bf16.mxu0 %v274_v1  ;;  %p258_p4 = pnand %p257_p3, %p251_p0 }
   0xe   :  { %231 = vmatpush3.bf16.msra.mxu0 %v244_v4 }
  0x11   :  { %233 = vmatmul.mubr.msk.bf16.vlgmr.msra.gmra.mrb[0].mxu0 %vm73_vm2, %v245_v5 }
  0xe4   :  { %v111_v7 = vpop.f32.mrb[0].mxu0 }
  0xe5   :  { %v118_v9 = vadd.f32 %v111_v7, %v32_v6  ;;  %v234_v10 = vpop.f32.mrb[1].mxu0 }
  0xe6   :  { %v114_v11 = vpop.f32.mrb[2].mxu0 }
  0xe7   :  { %121 = vst.msk [vmem:[#allocation2] sm:$0xff] %vm29_vm1, %v118_v9  ;;  %v119_v12 = vadd.f32 %v114_v11, %v33_v8  ;;  %v235_v13 = vpop.f32.mrb[3].mxu0 }
  0xe9   :  { %122 = vst.msk [vmem:[#allocation2 + $0x8] sm:$0xff] %vm29_vm1, %v119_v12 }
  0xee   :  { %v126_v17 = vld [vmem:[#allocation2] sm:$0xff] }
  0xef   :  { %v135_v18 = vadd.f32 %v212_v15, %v126_v17 }
  0xf0   :  { %v127_v20 = vld [vmem:[#allocation2 + $0x8] sm:$0xff] }
  0xf1   :  { %v141_v21 = vadd.f32 %v217_v16, %v135_v18  ;;  %v136_v22 = vadd.f32 %v212_v15, %v127_v20 }
  0xf3   :  { %v143_v23 = vsel %vm29_vm1, %v141_v21, 0.0  ;;  %v142_v24 = vadd.f32 %v218_v19, %v136_v22 }
  0xf4   :  { %144 = vadd.xlane.f32.xlu0 %v143_v23 }
  0xf5   :  { %v146_v25 = vsel %vm29_vm1, %v142_v24, 0.0 }
  0xf8   :  { %147 = vadd.xlane.f32.xlu0 %v146_v25 }
 0x181   :  { %v145_v26 = vpop.xlane.xlu0 %144 }
 0x182   :  { %v150_v27 = vmul.f32 0.03125, %v145_v26 }
 0x184   :  { %v152_v28 = vsub.f32 %v141_v21, %v150_v27 }
 0x185   :  { %v148_v29 = vpop.xlane.xlu0 %147 }
 0x186   :  { %v151_v30 = vmul.f32 0.03125, %v148_v29  ;;  %v154_v31 = vmul.f32 %v152_v28, %v152_v28 }
 0x188   :  { %v153_v32 = vsub.f32 %v142_v24, %v151_v30  ;;  %v156_v33 = vsel %vm29_vm1, %v154_v31, 0.0 }
 0x189   :  { %157 = vadd.xlane.f32.xlu1 %v156_v33 }
 0x18a   :  { %v155_v34 = vmul.f32 %v153_v32, %v153_v32 }
 0x18c   :  { %v159_v35 = vsel %vm29_vm1, %v155_v34, 0.0 }
 0x18d   :  { %160 = vadd.xlane.f32.xlu1 %v159_v35 }
 0x216   :  { %v158_v36 = vpop.xlane.xlu1 %157 }
 0x217   :  { %v162_v37 = vmul.f32 0.03125, %v158_v36 }
 0x219   :  { %v164_v38 = vadd.f32 1e-05, %v162_v37 }
 0x21a   :  { %v161_v39 = vpop.xlane.xlu1 %160 }
 0x21b   :  { %246 = vrsqrt.f32 %v164_v38  ;;  %v163_v40 = vmul.f32 0.03125, %v161_v39 }
 0x21d   :  { %v165_v41 = vadd.f32 1e-05, %v163_v40 }
 0x21f   :  { %248 = vrsqrt.f32 %v165_v41 }
 0x225   :  { %v247_v42 = vpop.eup %246 }
 0x226   :  { %v168_v44 = vmul.f32 %v247_v42, %v152_v28 }
 0x228   :  { %v177_v46 = vmul.f32 %v213_v43, %v168_v44 }
 0x229   :  { %v249_v47 = vpop.eup %248 }
 0x22a   :  { %v169_v48 = vmul.f32 %v249_v47, %v153_v32  ;;  %v186_v49 = vadd.f32 %v214_v45, %v177_v46 }
 0x22c   :  { %v178_v50 = vmul.f32 %v213_v43, %v169_v48  ;;  %188 = vst.msk [vmem:[#allocation3] sm:$0xff] %vm29_vm1, %v186_v49 }
 0x22e   :  { %v187_v51 = vadd.f32 %v214_v45, %v178_v50 }
 0x230   :  { %189 = vst.msk [vmem:[#allocation3 + $0x8] sm:$0xff] %vm29_vm1, %v187_v51 }
 0x231   :  { %261 = shalt.err (!%p258_p4)
}
 0x232   :  { %s262_s14 = scalar_lea.hbm %s369_s6, 256 }
 0x233   :  { %p263_p5 = scmp.ne.s32.totalorder %s369_s6, %s262_s14  ;;  %p266_p6 = scmp.lt.u32.totalorder %s262_s14, %s369_s6 }
 0x235   :  { %p268_p7 = pnand %p266_p6, %p263_p5 }
 0x237   :  { %271 = shalt.err (!%p268_p7)
}
 0x238   :  { %s277_s19 = smov 128   ;;  %s278_s20 = smov 8  }
 0x239   :  { %201 = dma.vmem_to_hbm [thread:$0]  %s196_s12, 256, %s369_s6, [#allocation4], %s277_s19, %s277_s19, %s278_s20  }
 0x23a   :  { %272 = dma.done.wait [#allocation4], 256  }
 0x23b   :  { %273 = vsyncadd [#allocation4], 4294967040 }
 0x23c   :  { %205 = vsyncpa [#allocation4], 1 }

</bundles_post_ra>
